<compile_context>
chip_gen: v5e
topology: v5e:2x2
jax: 0.10.0
libtpu: 0.0.40
codegen_flags: <defaults>
</compile_context>

<pallas_src>
import functools

import jax
import jax.numpy as jnp
from jax.experimental import pallas as pl
from jax.experimental.pallas import tpu as pltpu


def _round_up(x: int, m: int) -> int:
    return (x + m - 1) // m * m


_BIG = jnp.iinfo(jnp.int32).max  # > any finite-f32 bit pattern


def _knn_kernel(p_ref, qT_ref, idx_ref, carry_ref, *,
                k: int, k_pad: int, tq: int, chunk: int, idx_bits: int):
    """One grid step: one candidate chunk vs one lane-dense tile of TQ queries.

    Grid axis 0 (parallel): query tiles.  Grid axis 1 (arbitrary): candidate
    chunks, with a running top-k carry of packed keys in `carry_ref`.
    """
    c = pl.program_id(1)
    n_chunks = pl.num_programs(1)
    n_dim = p_ref.shape[1]

    low_mask = (1 << idx_bits) - 1
    big = jnp.int32(_BIG)

    @pl.when(c == 0)
    def _():
        carry_ref[...] = jnp.full((k_pad, tq), _BIG, jnp.int32)

    p = p_ref[...].astype(jnp.float32)        # [chunk, D]  candidates (sublanes)
    qT = qT_ref[...].astype(jnp.float32)      # [D, TQ]     queries    (lanes)

    # Direct squared distances on the VPU (D is tiny; MXU not worth it and the
    # direct form avoids cancellation).
    d2 = jnp.zeros((chunk, tq), jnp.float32)
    for dd in range(n_dim):
        diff = p[:, dd:dd + 1] - qT[dd:dd + 1, :]       # [chunk,1] - [1,TQ]
        d2 = d2 + diff * diff

    # Pack (distance, GLOBAL candidate index) into one monotone int32 key:
    # non-negative f32 bit patterns order like ints, so zero the low
    # `idx_bits` mantissa bits and OR in the candidate index.  Keys are
    # unique per candidate (distinct low bits), so the threshold extraction
    # below pops exactly one entry per query column per step.
    cand_local = jax.lax.broadcasted_iota(jnp.int32, (chunk, tq), 0)
    cand_global = cand_local + c * chunk
    key_chunk = (pltpu.bitcast(d2, jnp.int32) & jnp.int32(~low_mask)) | cand_global

    # Self-loop exclusion (loop=False): candidate id == query id, i.e.
    # cand_local == q_local + (i*TQ - c*chunk).  One shifted-iota compare;
    # padded candidate rows are handled by their huge coordinates instead.
    q_local = jax.lax.broadcasted_iota(jnp.int32, (chunk, tq), 1)
    offset = pl.program_id(0) * tq - c * chunk
    key_chunk = jnp.where(cand_local == q_local + offset, big, key_chunk)

    # Merge the running top-k carry with this chunk's candidates.
    key = jnp.concatenate([carry_ref[...], key_chunk], axis=0)  # [k_pad+chunk, TQ]

    # Monotone-threshold top-k: keys stay immutable; extraction j is the min
    # of all keys strictly greater than the previously extracted key.  No
    # write-back of the big key array between extractions.
    rows = []
    prev = jnp.full((1, tq), jnp.iinfo(jnp.int32).min, jnp.int32)
    for _ in range(k):
        masked = jnp.where(key > prev, key, big)
        prev = jnp.min(masked, axis=0, keepdims=True)               # [1, TQ]
        rows.append(prev)
    for _ in range(k, k_pad):
        rows.append(jnp.full((1, tq), _BIG, jnp.int32))
    new_carry = jnp.concatenate(rows, axis=0)                       # [k_pad, TQ]
    carry_ref[...] = new_carry

    @pl.when(c == n_chunks - 1)
    def _():
        # Single aligned [k_pad, TQ] lane-dense store (no per-row stores).
        idx_ref[...] = new_carry & low_mask


def knn_neighbors_pallas(pos: jax.Array, k: int, *, tq: int = 128,
                         chunk: int = 256):
    """Returns nbr_idx [N, k] int32, neighbors of each node in ascending distance.

    Neighbor selection uses squared distances with the low ceil(log2(N_pad))
    mantissa bits truncated (index-packing trick); ties and near-ties are
    broken by smallest index.  Exact edge lengths should be recomputed from
    gathered positions (as aperiodic_knn_graph does).
    `tq` can be swept (256/512 on v5e/v6e) to amortize per-grid-step overhead;
    128 is a safe default (and preferred on v7x).
    """
    n, d = pos.shape
    assert n - 1 >= k, "need at least k other points"

    k_pad = _round_up(max(k, 8), 8)

    # Candidate axis (sublanes): stream in chunks; small point sets use a
    # single small chunk.  Pad rows get a huge coordinate so they are never
    # selected as neighbors.
    if n <= chunk:
        chunk = _round_up(n, 8)
    n_cand = _round_up(n, chunk)
    n_chunks = n_cand // chunk

    # Query axis (lanes): always full 128-lane tiles (lane-dense stores).
    n_q = _round_up(n, tq)
    n_qtiles = n_q // tq

    pos_f32 = pos.astype(jnp.float32)
    p_pad = jnp.pad(pos_f32, ((0, n_cand - n), (0, 0)),
                    constant_values=1.0e18)                   # [n_cand, D]
    qT_pad = jnp.pad(pos_f32.T, ((0, 0), (0, n_q - n)))       # [D, n_q]

    idx_bits = max(1, (n_cand - 1).bit_length())

    kernel = functools.partial(_knn_kernel, k=k, k_pad=k_pad, tq=tq,
                               chunk=chunk, idx_bits=idx_bits)

    idx_t = pl.pallas_call(
        kernel,
        out_shape=jax.ShapeDtypeStruct((k_pad, n_q), jnp.int32),
        grid_spec=pltpu.PrefetchScalarGridSpec(
            num_scalar_prefetch=0,
            grid=(n_qtiles, n_chunks),
            in_specs=[
                pl.BlockSpec((chunk, d), lambda i, c: (c, 0)),   # candidate chunk
                pl.BlockSpec((d, tq), lambda i, c: (0, i)),      # query coords
            ],
            out_specs=pl.BlockSpec((k_pad, tq), lambda i, c: (0, i)),
            scratch_shapes=[pltpu.VMEM((k_pad, tq), jnp.int32)],  # top-k carry
        ),
        compiler_params=pltpu.CompilerParams(
            dimension_semantics=("parallel", "arbitrary"),
            # Chunked working set is tiny; 32 MiB is a safe headroom on every
            # generation (raises v5e's 16 MiB scoped default).
            vmem_limit_bytes=32 * 1024 * 1024,
        ),
    )(p_pad, qT_pad)

    # Drop the k padding rows / query padding columns; transpose back to
    # [N, k] in the wrapper (cheap XLA op, keeps kernel stores lane-dense).
    nbr_idx = idx_t[:k, :n].T
    return nbr_idx


def aperiodic_knn_graph(datapoint: dict, k: int = 17):
    """JAX/Pallas equivalent of AperiodicKNN_PyG.forward / create_aperiodic_knn_graph."""
    pos = datapoint["pos"]                        # [N, D] float32
    n = pos.shape[0]

    nbr_idx = knn_neighbors_pallas(pos, k)        # [N, k]

    # Glue (plain JAX): PyG-style edge_index (source_to_target flow),
    # relative displacement vectors and exact edge lengths.
    dst = jnp.repeat(jnp.arange(n, dtype=jnp.int32), k)    # center node i
    src = nbr_idx.reshape(-1).astype(jnp.int32)             # neighbor node j
    edge_index = jnp.stack([src, dst], axis=0)               # [2, N*k]
    edge_vec = pos[src] - pos[dst]                            # [N*k, D]
    edge_len = jnp.linalg.norm(edge_vec, axis=-1)             # [N*k], exact

    return {
        "x": datapoint.get("x", None),
        "pos": pos,
        "edge_index": edge_index,
        "edge_vec": edge_vec,
        "edge_len": edge_len,
    }


class AperiodicKNNPallas:
    """Thin stateful wrapper mirroring the nn.Module interface."""

    def __init__(self, k: int = 17):
        self.k = k

    def __call__(self, datapoint: dict):
        return aperiodic_knn_graph(datapoint, self.k)


def _reference_knn(pos, k):
    """Pure-JAX reference for checking distances."""
    d2 = jnp.sum((pos[:, None, :] - pos[None, :, :]) ** 2, axis=-1)
    n = pos.shape[0]
    d2 = d2.at[jnp.arange(n), jnp.arange(n)].set(jnp.inf)
    neg_topk, idx = jax.lax.top_k(-d2, k)
    return idx, jnp.sqrt(-neg_topk)


if __name__ == "__main__":
    key = jax.random.PRNGKey(0)
    N, D, K = 64, 3, 17
    pos = jax.random.uniform(key, (N, D), dtype=jnp.float32) * 10.0

    datapoint = {"pos": pos, "x": jnp.ones((N, 4), dtype=jnp.float32)}

    module = AperiodicKNNPallas(k=K)
    graph = module(datapoint)
    jax.block_until_ready(graph["edge_index"])
    jax.block_until_ready(graph["edge_len"])

    # Sanity-check against a pure-JAX reference (compare sorted distances;
    # tie/selection order may legitimately differ).
    _, ref_dist = _reference_knn(pos, K)
    src = graph["edge_index"][0].reshape(N, K)
    dst = graph["edge_index"][1].reshape(N, K)
    got_dist = graph["edge_len"].reshape(N, K)

    assert graph["edge_index"].shape == (2, N * K)
    assert graph["edge_vec"].shape == (N * K, D)
    assert bool(jnp.all((src >= 0) & (src < N))), "neighbor index out of range"
    assert bool(jnp.all(src != dst)), "self-loop found"
    assert bool(jnp.all(dst == jnp.arange(N, dtype=jnp.int32)[:, None]))
    assert jnp.allclose(jnp.sort(got_dist, axis=1), jnp.sort(ref_dist, axis=1),
                        atol=1e-3, rtol=1e-3), "distance mismatch"

    print("KERNEL_OK")
</pallas_src>

<mosaic_0001>
module attributes {stable_mosaic.version = 11 : i64} {
  func.func @_knn_kernel(%arg0: i32, %arg1: i32, %arg2: memref<64x3xf32, #tpu.memory_space<vmem>>, %arg3: memref<3x128xf32, #tpu.memory_space<vmem>>, %arg4: memref<24x128xi32, #tpu.memory_space<vmem>>, %arg5: memref<24x128xi32, #tpu.memory_space<vmem>>) attributes {dimension_semantics = [#tpu.dimension_semantics<parallel>, #tpu.dimension_semantics<arbitrary>], iteration_bounds = array<i64: 1, 1>, scalar_prefetch = 0 : i64, scratch_operands = 1 : i64, tpu.core_type = #tpu.core_type<tc>, window_params = [{transform_indices = @transform_0, window_bounds = array<i64: 64, 3>}, {transform_indices = @transform_1, window_bounds = array<i64: 3, 128>}, {transform_indices = @transform_2, window_bounds = array<i64: 24, 128>}]} {
    %c0_i32 = arith.constant 0 : i32
    %0 = arith.cmpi eq, %arg1, %c0_i32 : i32
    %1 = arith.extui %0 : i1 to i32
    %c0_i32_0 = arith.constant 0 : i32
    %2 = arith.cmpi ne, %1, %c0_i32_0 : i32
    scf.if %2 {
      %c2147483647_i32_52 = arith.constant 2147483647 : i32
      %163 = vector.broadcast %c2147483647_i32_52 : i32 to vector<24x128xi32>
      %c0_53 = arith.constant 0 : index
      %c0_54 = arith.constant 0 : index
      %164 = vector.load %arg5[%c0_53, %c0_54] : memref<24x128xi32, #tpu.memory_space<vmem>>, vector<24x128xi32>
      tpu.vector_store %arg5[%c0_53, %c0_54], %163 {strides = array<i32>} : memref<24x128xi32, #tpu.memory_space<vmem>>, vector<24x128xi32>,
    } else {
    }
    %c0 = arith.constant 0 : index
    %c0_1 = arith.constant 0 : index
    %3 = vector.load %arg2[%c0, %c0_1] : memref<64x3xf32, #tpu.memory_space<vmem>>, vector<64x3xf32>
    %c0_2 = arith.constant 0 : index
    %c0_3 = arith.constant 0 : index
    %4 = vector.load %arg3[%c0_2, %c0_3] : memref<3x128xf32, #tpu.memory_space<vmem>>, vector<3x128xf32>
    %cst = arith.constant 0.000000e+00 : f32
    %5 = vector.broadcast %cst : f32 to vector<64x128xf32>
    %6 = vector.extract_strided_slice %3 {offsets = [0, 0], sizes = [64, 1], strides = [1, 1]} : vector<64x3xf32> to vector<64x1xf32>
    %7 = vector.extract_strided_slice %4 {offsets = [0, 0], sizes = [1, 128], strides = [1, 1]} : vector<3x128xf32> to vector<1x128xf32>
    %8 = vector.broadcast %6 : vector<64x1xf32> to vector<64x128xf32>
    %9 = vector.broadcast %7 : vector<1x128xf32> to vector<64x128xf32>
    %10 = arith.subf %8, %9 : vector<64x128xf32>
    %11 = arith.mulf %10, %10 : vector<64x128xf32>
    %12 = arith.addf %5, %11 : vector<64x128xf32>
    %13 = vector.extract_strided_slice %3 {offsets = [0, 1], sizes = [64, 1], strides = [1, 1]} : vector<64x3xf32> to vector<64x1xf32>
    %14 = vector.extract_strided_slice %4 {offsets = [1, 0], sizes = [1, 128], strides = [1, 1]} : vector<3x128xf32> to vector<1x128xf32>
    %15 = vector.broadcast %13 : vector<64x1xf32> to vector<64x128xf32>
    %16 = vector.broadcast %14 : vector<1x128xf32> to vector<64x128xf32>
    %17 = arith.subf %15, %16 : vector<64x128xf32>
    %18 = arith.mulf %17, %17 : vector<64x128xf32>
    %19 = arith.addf %12, %18 : vector<64x128xf32>
    %20 = vector.extract_strided_slice %3 {offsets = [0, 2], sizes = [64, 1], strides = [1, 1]} : vector<64x3xf32> to vector<64x1xf32>
    %21 = vector.extract_strided_slice %4 {offsets = [2, 0], sizes = [1, 128], strides = [1, 1]} : vector<3x128xf32> to vector<1x128xf32>
    %22 = vector.broadcast %20 : vector<64x1xf32> to vector<64x128xf32>
    %23 = vector.broadcast %21 : vector<1x128xf32> to vector<64x128xf32>
    %24 = arith.subf %22, %23 : vector<64x128xf32>
    %25 = arith.mulf %24, %24 : vector<64x128xf32>
    %26 = arith.addf %19, %25 : vector<64x128xf32>
    %27 = tpu.iota {dimensions = array<i32: 0>} : vector<64x128xi32>
    %c64_i32 = arith.constant 64 : i32
    %28 = arith.muli %arg1, %c64_i32 : i32
    %29 = vector.broadcast %28 : i32 to vector<64x128xi32>
    %30 = arith.addi %27, %29 : vector<64x128xi32>
    %31 = tpu.bitcast %26 : vector<64x128xf32> -> vector<64x128xi32>
    %c-64_i32 = arith.constant -64 : i32
    %32 = vector.broadcast %c-64_i32 : i32 to vector<64x128xi32>
    %33 = arith.andi %31, %32 : vector<64x128xi32>
    %34 = arith.ori %33, %30 : vector<64x128xi32>
    %35 = tpu.iota {dimensions = array<i32: 1>} : vector<64x128xi32>
    %c128_i32 = arith.constant 128 : i32
    %36 = arith.muli %arg0, %c128_i32 : i32
    %c64_i32_4 = arith.constant 64 : i32
    %37 = arith.muli %arg1, %c64_i32_4 : i32
    %38 = arith.subi %36, %37 : i32
    %39 = vector.broadcast %38 : i32 to vector<64x128xi32>
    %40 = arith.addi %35, %39 : vector<64x128xi32>
    %41 = arith.cmpi eq, %27, %40 : vector<64x128xi32>
    %c2147483647_i32 = arith.constant 2147483647 : i32
    %42 = vector.broadcast %c2147483647_i32 : i32 to vector<64x128xi32>
    %43 = arith.select %41, %42, %34 : vector<64x128xi1>, vector<64x128xi32>
    %c0_5 = arith.constant 0 : index
    %c0_6 = arith.constant 0 : index
    %44 = vector.load %arg5[%c0_5, %c0_6] : memref<24x128xi32, #tpu.memory_space<vmem>>, vector<24x128xi32>
    %45 = tpu.concatenate %44, %43 in 0 : vector<24x128xi32>, vector<64x128xi32> -> vector<88x128xi32>
    %c-2147483648_i32 = arith.constant -2147483648 : i32
    %46 = vector.broadcast %c-2147483648_i32 : i32 to vector<1x128xi32>
    %47 = vector.broadcast %46 : vector<1x128xi32> to vector<88x128xi32>
    %48 = arith.cmpi sgt, %45, %47 : vector<88x128xi32>
    %c2147483647_i32_7 = arith.constant 2147483647 : i32
    %49 = vector.broadcast %c2147483647_i32_7 : i32 to vector<88x128xi32>
    %50 = arith.select %48, %45, %49 : vector<88x128xi1>, vector<88x128xi32>
    %cst_8 = arith.constant dense<2147483647> : vector<128xi32>
    %51 = vector.multi_reduction <minsi>, %50, %cst_8 [0] : vector<88x128xi32> to vector<128xi32>
    %52 = vector.shape_cast %51 : vector<128xi32> to vector<1x128xi32>
    %53 = vector.broadcast %52 : vector<1x128xi32> to vector<88x128xi32>
    %54 = arith.cmpi sgt, %45, %53 : vector<88x128xi32>
    %c2147483647_i32_9 = arith.constant 2147483647 : i32
    %55 = vector.broadcast %c2147483647_i32_9 : i32 to vector<88x128xi32>
    %56 = arith.select %54, %45, %55 : vector<88x128xi1>, vector<88x128xi32>
    %cst_10 = arith.constant dense<2147483647> : vector<128xi32>
    %57 = vector.multi_reduction <minsi>, %56, %cst_10 [0] : vector<88x128xi32> to vector<128xi32>
    %58 = vector.shape_cast %57 : vector<128xi32> to vector<1x128xi32>
    %59 = vector.broadcast %58 : vector<1x128xi32> to vector<88x128xi32>
    %60 = arith.cmpi sgt, %45, %59 : vector<88x128xi32>
    %c2147483647_i32_11 = arith.constant 2147483647 : i32
    %61 = vector.broadcast %c2147483647_i32_11 : i32 to vector<88x128xi32>
    %62 = arith.select %60, %45, %61 : vector<88x128xi1>, vector<88x128xi32>
    %cst_12 = arith.constant dense<2147483647> : vector<128xi32>
    %63 = vector.multi_reduction <minsi>, %62, %cst_12 [0] : vector<88x128xi32> to vector<128xi32>
    %64 = vector.shape_cast %63 : vector<128xi32> to vector<1x128xi32>
    %65 = vector.broadcast %64 : vector<1x128xi32> to vector<88x128xi32>
    %66 = arith.cmpi sgt, %45, %65 : vector<88x128xi32>
    %c2147483647_i32_13 = arith.constant 2147483647 : i32
    %67 = vector.broadcast %c2147483647_i32_13 : i32 to vector<88x128xi32>
    %68 = arith.select %66, %45, %67 : vector<88x128xi1>, vector<88x128xi32>
    %cst_14 = arith.constant dense<2147483647> : vector<128xi32>
    %69 = vector.multi_reduction <minsi>, %68, %cst_14 [0] : vector<88x128xi32> to vector<128xi32>
    %70 = vector.shape_cast %69 : vector<128xi32> to vector<1x128xi32>
    %71 = vector.broadcast %70 : vector<1x128xi32> to vector<88x128xi32>
    %72 = arith.cmpi sgt, %45, %71 : vector<88x128xi32>
    %c2147483647_i32_15 = arith.constant 2147483647 : i32
    %73 = vector.broadcast %c2147483647_i32_15 : i32 to vector<88x128xi32>
    %74 = arith.select %72, %45, %73 : vector<88x128xi1>, vector<88x128xi32>
    %cst_16 = arith.constant dense<2147483647> : vector<128xi32>
    %75 = vector.multi_reduction <minsi>, %74, %cst_16 [0] : vector<88x128xi32> to vector<128xi32>
    %76 = vector.shape_cast %75 : vector<128xi32> to vector<1x128xi32>
    %77 = vector.broadcast %76 : vector<1x128xi32> to vector<88x128xi32>
    %78 = arith.cmpi sgt, %45, %77 : vector<88x128xi32>
    %c2147483647_i32_17 = arith.constant 2147483647 : i32
    %79 = vector.broadcast %c2147483647_i32_17 : i32 to vector<88x128xi32>
    %80 = arith.select %78, %45, %79 : vector<88x128xi1>, vector<88x128xi32>
    %cst_18 = arith.constant dense<2147483647> : vector<128xi32>
    %81 = vector.multi_reduction <minsi>, %80, %cst_18 [0] : vector<88x128xi32> to vector<128xi32>
    %82 = vector.shape_cast %81 : vector<128xi32> to vector<1x128xi32>
    %83 = vector.broadcast %82 : vector<1x128xi32> to vector<88x128xi32>
    %84 = arith.cmpi sgt, %45, %83 : vector<88x128xi32>
    %c2147483647_i32_19 = arith.constant 2147483647 : i32
    %85 = vector.broadcast %c2147483647_i32_19 : i32 to vector<88x128xi32>
    %86 = arith.select %84, %45, %85 : vector<88x128xi1>, vector<88x128xi32>
    %cst_20 = arith.constant dense<2147483647> : vector<128xi32>
    %87 = vector.multi_reduction <minsi>, %86, %cst_20 [0] : vector<88x128xi32> to vector<128xi32>
    %88 = vector.shape_cast %87 : vector<128xi32> to vector<1x128xi32>
    %89 = vector.broadcast %88 : vector<1x128xi32> to vector<88x128xi32>
    %90 = arith.cmpi sgt, %45, %89 : vector<88x128xi32>
    %c2147483647_i32_21 = arith.constant 2147483647 : i32
    %91 = vector.broadcast %c2147483647_i32_21 : i32 to vector<88x128xi32>
    %92 = arith.select %90, %45, %91 : vector<88x128xi1>, vector<88x128xi32>
    %cst_22 = arith.constant dense<2147483647> : vector<128xi32>
    %93 = vector.multi_reduction <minsi>, %92, %cst_22 [0] : vector<88x128xi32> to vector<128xi32>
    %94 = vector.shape_cast %93 : vector<128xi32> to vector<1x128xi32>
    %95 = vector.broadcast %94 : vector<1x128xi32> to vector<88x128xi32>
    %96 = arith.cmpi sgt, %45, %95 : vector<88x128xi32>
    %c2147483647_i32_23 = arith.constant 2147483647 : i32
    %97 = vector.broadcast %c2147483647_i32_23 : i32 to vector<88x128xi32>
    %98 = arith.select %96, %45, %97 : vector<88x128xi1>, vector<88x128xi32>
    %cst_24 = arith.constant dense<2147483647> : vector<128xi32>
    %99 = vector.multi_reduction <minsi>, %98, %cst_24 [0] : vector<88x128xi32> to vector<128xi32>
    %100 = vector.shape_cast %99 : vector<128xi32> to vector<1x128xi32>
    %101 = vector.broadcast %100 : vector<1x128xi32> to vector<88x128xi32>
    %102 = arith.cmpi sgt, %45, %101 : vector<88x128xi32>
    %c2147483647_i32_25 = arith.constant 2147483647 : i32
    %103 = vector.broadcast %c2147483647_i32_25 : i32 to vector<88x128xi32>
    %104 = arith.select %102, %45, %103 : vector<88x128xi1>, vector<88x128xi32>
    %cst_26 = arith.constant dense<2147483647> : vector<128xi32>
    %105 = vector.multi_reduction <minsi>, %104, %cst_26 [0] : vector<88x128xi32> to vector<128xi32>
    %106 = vector.shape_cast %105 : vector<128xi32> to vector<1x128xi32>
    %107 = vector.broadcast %106 : vector<1x128xi32> to vector<88x128xi32>
    %108 = arith.cmpi sgt, %45, %107 : vector<88x128xi32>
    %c2147483647_i32_27 = arith.constant 2147483647 : i32
    %109 = vector.broadcast %c2147483647_i32_27 : i32 to vector<88x128xi32>
    %110 = arith.select %108, %45, %109 : vector<88x128xi1>, vector<88x128xi32>
    %cst_28 = arith.constant dense<2147483647> : vector<128xi32>
    %111 = vector.multi_reduction <minsi>, %110, %cst_28 [0] : vector<88x128xi32> to vector<128xi32>
    %112 = vector.shape_cast %111 : vector<128xi32> to vector<1x128xi32>
    %113 = vector.broadcast %112 : vector<1x128xi32> to vector<88x128xi32>
    %114 = arith.cmpi sgt, %45, %113 : vector<88x128xi32>
    %c2147483647_i32_29 = arith.constant 2147483647 : i32
    %115 = vector.broadcast %c2147483647_i32_29 : i32 to vector<88x128xi32>
    %116 = arith.select %114, %45, %115 : vector<88x128xi1>, vector<88x128xi32>
    %cst_30 = arith.constant dense<2147483647> : vector<128xi32>
    %117 = vector.multi_reduction <minsi>, %116, %cst_30 [0] : vector<88x128xi32> to vector<128xi32>
    %118 = vector.shape_cast %117 : vector<128xi32> to vector<1x128xi32>
    %119 = vector.broadcast %118 : vector<1x128xi32> to vector<88x128xi32>
    %120 = arith.cmpi sgt, %45, %119 : vector<88x128xi32>
    %c2147483647_i32_31 = arith.constant 2147483647 : i32
    %121 = vector.broadcast %c2147483647_i32_31 : i32 to vector<88x128xi32>
    %122 = arith.select %120, %45, %121 : vector<88x128xi1>, vector<88x128xi32>
    %cst_32 = arith.constant dense<2147483647> : vector<128xi32>
    %123 = vector.multi_reduction <minsi>, %122, %cst_32 [0] : vector<88x128xi32> to vector<128xi32>
    %124 = vector.shape_cast %123 : vector<128xi32> to vector<1x128xi32>
    %125 = vector.broadcast %124 : vector<1x128xi32> to vector<88x128xi32>
    %126 = arith.cmpi sgt, %45, %125 : vector<88x128xi32>
    %c2147483647_i32_33 = arith.constant 2147483647 : i32
    %127 = vector.broadcast %c2147483647_i32_33 : i32 to vector<88x128xi32>
    %128 = arith.select %126, %45, %127 : vector<88x128xi1>, vector<88x128xi32>
    %cst_34 = arith.constant dense<2147483647> : vector<128xi32>
    %129 = vector.multi_reduction <minsi>, %128, %cst_34 [0] : vector<88x128xi32> to vector<128xi32>
    %130 = vector.shape_cast %129 : vector<128xi32> to vector<1x128xi32>
    %131 = vector.broadcast %130 : vector<1x128xi32> to vector<88x128xi32>
    %132 = arith.cmpi sgt, %45, %131 : vector<88x128xi32>
    %c2147483647_i32_35 = arith.constant 2147483647 : i32
    %133 = vector.broadcast %c2147483647_i32_35 : i32 to vector<88x128xi32>
    %134 = arith.select %132, %45, %133 : vector<88x128xi1>, vector<88x128xi32>
    %cst_36 = arith.constant dense<2147483647> : vector<128xi32>
    %135 = vector.multi_reduction <minsi>, %134, %cst_36 [0] : vector<88x128xi32> to vector<128xi32>
    %136 = vector.shape_cast %135 : vector<128xi32> to vector<1x128xi32>
    %137 = vector.broadcast %136 : vector<1x128xi32> to vector<88x128xi32>
    %138 = arith.cmpi sgt, %45, %137 : vector<88x128xi32>
    %c2147483647_i32_37 = arith.constant 2147483647 : i32
    %139 = vector.broadcast %c2147483647_i32_37 : i32 to vector<88x128xi32>
    %140 = arith.select %138, %45, %139 : vector<88x128xi1>, vector<88x128xi32>
    %cst_38 = arith.constant dense<2147483647> : vector<128xi32>
    %141 = vector.multi_reduction <minsi>, %140, %cst_38 [0] : vector<88x128xi32> to vector<128xi32>
    %142 = vector.shape_cast %141 : vector<128xi32> to vector<1x128xi32>
    %143 = vector.broadcast %142 : vector<1x128xi32> to vector<88x128xi32>
    %144 = arith.cmpi sgt, %45, %143 : vector<88x128xi32>
    %c2147483647_i32_39 = arith.constant 2147483647 : i32
    %145 = vector.broadcast %c2147483647_i32_39 : i32 to vector<88x128xi32>
    %146 = arith.select %144, %45, %145 : vector<88x128xi1>, vector<88x128xi32>
    %cst_40 = arith.constant dense<2147483647> : vector<128xi32>
    %147 = vector.multi_reduction <minsi>, %146, %cst_40 [0] : vector<88x128xi32> to vector<128xi32>
    %148 = vector.shape_cast %147 : vector<128xi32> to vector<1x128xi32>
    %c2147483647_i32_41 = arith.constant 2147483647 : i32
    %149 = vector.broadcast %c2147483647_i32_41 : i32 to vector<1x128xi32>
    %c2147483647_i32_42 = arith.constant 2147483647 : i32
    %150 = vector.broadcast %c2147483647_i32_42 : i32 to vector<1x128xi32>
    %c2147483647_i32_43 = arith.constant 2147483647 : i32
    %151 = vector.broadcast %c2147483647_i32_43 : i32 to vector<1x128xi32>
    %c2147483647_i32_44 = arith.constant 2147483647 : i32
    %152 = vector.broadcast %c2147483647_i32_44 : i32 to vector<1x128xi32>
    %c2147483647_i32_45 = arith.constant 2147483647 : i32
    %153 = vector.broadcast %c2147483647_i32_45 : i32 to vector<1x128xi32>
    %c2147483647_i32_46 = arith.constant 2147483647 : i32
    %154 = vector.broadcast %c2147483647_i32_46 : i32 to vector<1x128xi32>
    %c2147483647_i32_47 = arith.constant 2147483647 : i32
    %155 = vector.broadcast %c2147483647_i32_47 : i32 to vector<1x128xi32>
    %156 = tpu.concatenate %52, %58, %64, %70, %76, %82, %88, %94, %100, %106, %112, %118, %124, %130, %136, %142 in 0 : vector<1x128xi32>, vector<1x128xi32>, vector<1x128xi32>, vector<1x128xi32>, vector<1x128xi32>, vector<1x128xi32>, vector<1x128xi32>, vector<1x128xi32>, vector<1x128xi32>, vector<1x128xi32>, vector<1x128xi32>, vector<1x128xi32>, vector<1x128xi32>, vector<1x128xi32>, vector<1x128xi32>, vector<1x128xi32> -> vector<16x128xi32>
    %157 = tpu.concatenate %148, %149, %150, %151, %152, %153, %154, %155 in 0 : vector<1x128xi32>, vector<1x128xi32>, vector<1x128xi32>, vector<1x128xi32>, vector<1x128xi32>, vector<1x128xi32>, vector<1x128xi32>, vector<1x128xi32> -> vector<8x128xi32>
    %158 = tpu.concatenate %156, %157 in 0 : vector<16x128xi32>, vector<8x128xi32> -> vector<24x128xi32>
    %c0_48 = arith.constant 0 : index
    %c0_49 = arith.constant 0 : index
    %159 = vector.load %arg5[%c0_48, %c0_49] : memref<24x128xi32, #tpu.memory_space<vmem>>, vector<24x128xi32>
    tpu.vector_store %arg5[%c0_48, %c0_49], %158 {strides = array<i32>} : memref<24x128xi32, #tpu.memory_space<vmem>>, vector<24x128xi32>,
    %c0_i32_50 = arith.constant 0 : i32
    %160 = arith.cmpi eq, %arg1, %c0_i32_50 : i32
    %161 = arith.extui %160 : i1 to i32
    %c0_i32_51 = arith.constant 0 : i32
    %162 = arith.cmpi ne, %161, %c0_i32_51 : i32
    scf.if %162 {
      %c63_i32 = arith.constant 63 : i32
      %163 = vector.broadcast %c63_i32 : i32 to vector<24x128xi32>
      %164 = arith.andi %158, %163 : vector<24x128xi32>
      %c0_52 = arith.constant 0 : index
      %c0_53 = arith.constant 0 : index
      %165 = vector.load %arg4[%c0_52, %c0_53] : memref<24x128xi32, #tpu.memory_space<vmem>>, vector<24x128xi32>
      tpu.vector_store %arg4[%c0_52, %c0_53], %164 {strides = array<i32>} : memref<24x128xi32, #tpu.memory_space<vmem>>, vector<24x128xi32>,
    } else {
    }
    return
  }
  func.func @transform_0(%arg0: i32, %arg1: i32) -> (i32, i32) {
    %c0_i32 = arith.constant 0 : i32
    %c0_i32_0 = arith.constant 0 : i32
    return %arg1, %c0_i32 : i32, i32
  }
  func.func @transform_1(%arg0: i32, %arg1: i32) -> (i32, i32) {
    %c0_i32 = arith.constant 0 : i32
    %c0_i32_0 = arith.constant 0 : i32
    return %c0_i32, %arg0 : i32, i32
  }
  func.func @transform_2(%arg0: i32, %arg1: i32) -> (i32, i32) {
    %c0_i32 = arith.constant 0 : i32
    %c0_i32_0 = arith.constant 0 : i32
    return %c0_i32, %arg0 : i32, i32
  }
}

</mosaic_0001>

<bundles_post_ra>
// kernel: tpu_custom_call.1
= control target key start
LH: loop header
LB: loop body
LE: loop exit
PB: predicated region body
PF: predicated region fallthrough
CT: control target
= control target key end

     0   :  { %v1311_v3 = vmov 1   ;;  %v1312_v4 = vmov 0   ;;  %s1792_s0 = inlined_call_operand.vmem [shape: f32[64,3], index: 0, kind: input, shape index: {}]   ;;  %s1793_s1 = inlined_call_operand.vmem [shape: f32[3,128], index: 1, kind: input, shape index: {}]   ;;  %s1794_s2 = inlined_call_operand.hbm [shape: s32[24,128], index: 2, kind: output, shape index: {}]  }
   0x1   :  { %v22_v0 = vld [vmem:[%s1792_s0 + $0x18] sm:$0xff]  ;;  %v21_v1 = vld [vmem:[%s1792_s0 + $0x10] sm:$0xff]  ;;  %v20_v2 = vld [vmem:[%s1792_s0 + $0x8] sm:$0xff]  ;;  %1276 = vset.pattern.permute.xlu2 %v1311_v3  ;;  %1274 = vset.pattern.permute.xlu1 %v1312_v4 }
   0x2   :  { %1273 = vset.pattern.permute.xlu0 %v1312_v4  ;;  %45 = vperm.xlu1 %1274, %v22_v0  }
   0x3   :  { %7 = vsyncpa [#allocation4], 0  ;;  %102 = vperm.xlu2 %1276, %v21_v1   ;;  %35 = vperm.xlu0 %1273, %v20_v2   ;;  %v19_v5 = vld [vmem:[%s1792_s0] sm:$0xff]  ;;  %v24_v6 = vld [vmem:[%s1792_s0 + $0x28] sm:$0xff]  ;;  %v1313_v10 = vmov 2   ;;  %v207_v41 = vlaneseq  ;;  %s1188_s29 = sshll.u32 %s1794_s2, 4  ;;  %s1189_s29 = int_to_ptr.hbm [resolvable:$true] %s1188_s29 }
   0x4   :  { %v23_v7 = vld [vmem:[%s1792_s0 + $0x20] sm:$0xff]  ;;  %v25_v8 = vld [vmem:[%s1792_s0 + $0x30] sm:$0xff]  ;;  %v26_v9 = vld [vmem:[%s1792_s0 + $0x38] sm:$0xff]  ;;  %s1315_s30 = smov 128   ;;  %s1316_s3 = smov 8  }
   0x5   :  { %v27_v26 = vld [vmem:[%s1793_s1] sm:$0x7]  ;;  %v1383_v54 = vshrl.u32 %v207_v41, 7  ;;  %s1314_s1 = smov [#allocation3]  }
   0x6   :  { %v1363_v29 = vperm.slane %v27_v26, 1  ;;  %v1365_v30 = vperm.slane %v27_v26, 0  ;;  %v1368_v32 = vperm.slane %v27_v26, 2  ;;  %s1186_s26 = sshll.u32 %s1314_s1, 4  ;;  %s1187_s26 = int_to_ptr.vmem [resolvable:$true] %s1186_s26 }
   0xa   :  { %1275 = vset.pattern.permute.xlu1 %v1311_v3 }
   0xb   :  { %106 = vperm.xlu2 %1276, %v22_v0   ;;  %40 = vperm.xlu0 %1273, %v21_v1  }
   0xc   :  { %98 = vperm.xlu1 %1275, %v20_v2  }
  0x13   :  { %1278 = vset.pattern.permute.xlu2 %v1312_v4  ;;  %30 = vperm.xlu0 %1273, %v19_v5  }
  0x14   :  { %55 = vperm.xlu2 %1278, %v24_v6   ;;  %1277 = vset.pattern.permute.xlu1 %v1312_v4 }
  0x15   :  { %50 = vperm.xlu1 %1277, %v23_v7  }
  0x1b   :  { %60 = vperm.xlu0 %1273, %v25_v8  }
  0x1c   :  { %1279 = vset.pattern.permute.xlu2 %v1311_v3 }
  0x1d   :  { %65 = vperm.xlu1 %1277, %v26_v9   ;;  %94 = vperm.xlu2 %1279, %v19_v5  }
  0x23   :  { %1280 = vset.pattern.permute.xlu0 %v1311_v3 }
  0x24   :  { %110 = vperm.xlu0 %1280, %v23_v7  }
  0x25   :  { %1281 = vset.pattern.permute.xlu1 %v1311_v3  ;;  %118 = vperm.xlu2 %1279, %v25_v8  }
  0x26   :  { %114 = vperm.xlu1 %1281, %v24_v6  }
  0x2c   :  { %1283 = vset.pattern.permute.xlu0 %v1313_v10 }
  0x2d   :  { %1282 = vset.pattern.permute.xlu2 %v1313_v10  ;;  %159 = vperm.xlu0 %1283, %v21_v1  }
  0x2e   :  { %122 = vperm.xlu1 %1281, %v26_v9   ;;  %155 = vperm.xlu2 %1282, %v20_v2  }
  0x35   :  { %175 = vperm.xlu0 %1283, %v25_v8  }
  0x36   :  { %1284 = vset.pattern.permute.xlu1 %v1313_v10  ;;  %151 = vperm.xlu2 %1282, %v19_v5   ;;  %v209_v10 = vadd.s32 8, %v1383_v54 }
  0x37   :  { %163 = vperm.xlu1 %1284, %v22_v0  }
  0x3e   :  { %171 = vperm.xlu2 %1282, %v24_v6  }
  0x3f   :  { %167 = vperm.xlu1 %1284, %v23_v7  }
  0x47   :  { %179 = vperm.xlu1 %1284, %v26_v9  }
  0x5d   :  { %v103_v11 = vpop.permute.xlu2 %102 }
  0x5e   :  { %v128_v31 = vsub.f32 %v103_v11, %v1363_v29 }
  0x60   :  { %v136_v40 = vmul.f32 %v128_v31, %v128_v31  ;;  %v1396_v31 = vand.u32 127, %v207_v41  ;;  %v211_v41 = vadd.s32 24, %v1383_v54 }
  0x62   :  { %vm257_vm1 = vcmp.eq.s32.totalorder %v209_v10, %v1396_v31  ;;  %vm259_vm4 = vcmp.eq.s32.totalorder %v211_v41, %v1396_v31  ;;  %vm256_vm8 = vcmp.eq.s32.totalorder %v1383_v54, %v1396_v31 }
  0x65   :  { %v107_v12 = vpop.permute.xlu2 %106 }
  0x66   :  { %v129_v37 = vsub.f32 %v107_v12, %v1363_v29 }
  0x68   :  { %v137_v52 = vmul.f32 %v129_v37, %v129_v37 }
  0x6e   :  { %v56_v13 = vpop.permute.xlu2 %55 }
  0x6f   :  { %v74_v44 = vsub.f32 %v56_v13, %v1365_v30 }
  0x71   :  { %v82_v58 = vmul.f32 %v74_v44, %v74_v44 }
  0x74   :  { %v46_v14 = vpop.permute.xlu1 %45 }
  0x75   :  { %v36_v15 = vpop.permute.xlu0 %35  ;;  %v72_v49 = vsub.f32 %v46_v14, %v1365_v30 }
  0x76   :  { %v70_v34 = vsub.f32 %v36_v15, %v1365_v30 }
  0x77   :  { %v95_v16 = vpop.permute.xlu2 %94  ;;  %v80_v62 = vmul.f32 %v72_v49, %v72_v49 }
  0x78   :  { %v78_v50 = vmul.f32 %v70_v34, %v70_v34  ;;  %v126_v63 = vsub.f32 %v95_v16, %v1363_v29 }
  0x79   :  { %v145_v14 = vadd.f32 %v137_v52, %v80_v62 }
  0x7a   :  { %v134_v15 = vmul.f32 %v126_v63, %v126_v63 }
  0x7d   :  { %v41_v17 = vpop.permute.xlu0 %40 }
  0x7e   :  { %v99_v18 = vpop.permute.xlu1 %98  ;;  %v71_v33 = vsub.f32 %v41_v17, %v1365_v30 }
  0x7f   :  { %v119_v20 = vpop.permute.xlu2 %118  ;;  %v127_v35 = vsub.f32 %v99_v18, %v1363_v29  ;;  %v210_v18 = vadd.s32 16, %v1383_v54 }
  0x80   :  { %v79_v45 = vmul.f32 %v71_v33, %v71_v33  ;;  %v132_v46 = vsub.f32 %v119_v20, %v1363_v29 }
  0x81   :  { %v135_v51 = vmul.f32 %v127_v35, %v127_v35  ;;  %vm258_vm0 = vcmp.eq.s32.totalorder %v210_v18, %v1396_v31 }
  0x82   :  { %v144_v59 = vadd.f32 %v136_v40, %v79_v45  ;;  %v140_v60 = vmul.f32 %v132_v46, %v132_v46 }
  0x83   :  { %v143_v0 = vadd.f32 %v135_v51, %v78_v50 }
  0x85   :  { %v31_v19 = vpop.permute.xlu0 %30 }
  0x86   :  { %v69_v1 = vsub.f32 %v31_v19, %v1365_v30 }
  0x87   :  { %v1356_v21 = vpop.permute.xlu1 %50 }
  0x88   :  { %v156_v24 = vpop.permute.xlu2 %155  ;;  %v77_v16 = vmul.f32 %v69_v1, %v69_v1 }
  0x89   :  { %v184_v42 = vsub.f32 %v156_v24, %v1368_v32  ;;  %v73_v24 = vsub.f32 %v1356_v21, %v1365_v30 }
  0x8a   :  { %v142_v34 = vadd.f32 %v134_v15, %v77_v16 }
  0x8b   :  { %v192_v55 = vmul.f32 %v184_v42, %v184_v42  ;;  %v81_v40 = vmul.f32 %v73_v24, %v73_v24 }
  0x8d   :  { %v61_v22 = vpop.permute.xlu0 %60  ;;  %v200_v5 = vadd.f32 %v192_v55, %v143_v0 }
  0x8e   :  { %v75_v47 = vsub.f32 %v61_v22, %v1365_v30 }
  0x8f   :  { %v1358_v23 = vpop.permute.xlu1 %65  ;;  %v235_v26 = vand.u32 4294967232, %v200_v5 }
  0x90   :  { %v152_v28 = vpop.permute.xlu2 %151  ;;  %v83_v61 = vmul.f32 %v75_v47, %v75_v47  ;;  %v76_v47 = vsub.f32 %v1358_v23, %v1365_v30 }
  0x91   :  { %v183_v6 = vsub.f32 %v152_v28, %v1368_v32  ;;  %v243_v42 = vor.u32 %v235_v26, %v209_v10 }
  0x92   :  { %v148_v11 = vadd.f32 %v140_v60, %v83_v61 }
  0x96   :  { %v111_v25 = vpop.permute.xlu0 %110 }
  0x97   :  { %v130_v17 = vsub.f32 %v111_v25, %v1363_v29  ;;  %v213_v25 = vadd.s32 40, %v1383_v54 }
  0x98   :  { %v115_v27 = vpop.permute.xlu1 %114  ;;  %v172_v48 = vpop.permute.xlu2 %171 }
  0x99   :  { %v131_v43 = vsub.f32 %v115_v27, %v1363_v29  ;;  %v188_v57 = vsub.f32 %v172_v48, %v1368_v32  ;;  %v191_v27 = vmul.f32 %v183_v6, %v183_v6  ;;  %v138_v35 = vmul.f32 %v130_v17, %v130_v17 }
  0x9a   :  { %vm261_vm3 = vcmp.eq.s32.totalorder %v213_v25, %v1396_v31 }
  0x9b   :  { %v139_v56 = vmul.f32 %v131_v43, %v131_v43  ;;  %v196_v8 = vmul.f32 %v188_v57, %v188_v57  ;;  %v199_v43 = vadd.f32 %v191_v27, %v142_v34  ;;  %v146_v48 = vadd.f32 %v138_v35, %v81_v40 }
  0x9c   :  { %v212_v57 = vadd.s32 32, %v1383_v54 }
  0x9d   :  { %v147_v7 = vadd.f32 %v139_v56, %v82_v58  ;;  %v234_v55 = vand.u32 4294967232, %v199_v43 }
  0x9e   :  { %vm260_vm7 = vcmp.eq.s32.totalorder %v212_v57, %v1396_v31 }
  0x9f   :  { %v160_v36 = vpop.permute.xlu0 %159  ;;  %v204_v28 = vadd.f32 %v196_v8, %v147_v7  ;;  %v242_v60 = vor.u32 %v234_v55, %v1383_v54  ;;  %v215_v7 = vadd.s32 56, %v1383_v54 }
  0xa0   :  { %v185_v38 = vsub.f32 %v160_v36, %v1368_v32  ;;  %v1375_v39 = vpop.permute.xlu1 %122  ;;  %v214_v36 = vadd.s32 48, %v1383_v54 }
  0xa1   :  { %v239_v21 = vand.u32 4294967232, %v204_v28  ;;  %v133_v50 = vsub.f32 %v1375_v39, %v1363_v29  ;;  %v84_v39 = vmul.f32 %v76_v47, %v76_v47  ;;  %vm263_vm15 = vcmp.eq.s32.totalorder %v215_v7, %v1396_v31 }
  0xa2   :  { %v193_v53 = vmul.f32 %v185_v38, %v185_v38  ;;  %vm262_vm2 = vcmp.eq.s32.totalorder %v214_v36, %v1396_v31 }
  0xa3   :  { %v247_v56 = vor.u32 %v239_v21, %v213_v25  ;;  %v141_v30 = vmul.f32 %v133_v50, %v133_v50 }
  0xa4   :  { %v201_v3 = vadd.f32 %v193_v53, %v144_v59  ;;  %v1411_v53 = vsel %vm257_vm1, 2147483647, %v243_v42 }
  0xa5   :  { %vm279_vm6 = vcmp.gt.s32.totalorder %v1411_v53, 2147483648  ;;  %v1421_v61 = vsel %vm261_vm3, 2147483647, %v247_v56 }
  0xa6   :  { %v236_v19 = vand.u32 4294967232, %v201_v3  ;;  %v290_v3 = vsel %vm279_vm6, %v1411_v53, 2147483647  ;;  %vm283_vm10 = vcmp.gt.s32.totalorder %v1421_v61, 2147483648 }
  0xa7   :  { %v176_v2 = vpop.permute.xlu0 %175  ;;  %v294_v10 = vsel %vm283_vm10, %v1421_v61, 2147483647  ;;  %vm1200_vm14 = vcmp.gt.s32.totalorder %v290_v3, 2147483647 }
  0xa8   :  { %v189_v4 = vsub.f32 %v176_v2, %v1368_v32  ;;  %v244_v37 = vor.u32 %v236_v19, %v210_v18  ;;  %v298_v15 = vsel %vm1200_vm14, 2147483647, %v290_v3 }
  0xa9   :  { %v164_v9 = vpop.permute.xlu1 %163  ;;  %vm305_vm3 = vcmp.lt.s32.totalorder %v298_v15, %v294_v10 }
  0xaa   :  { %v197_v12 = vmul.f32 %v189_v4, %v189_v4  ;;  %v186_v13 = vsub.f32 %v164_v9, %v1368_v32  ;;  %v1407_v49 = vsel %vm258_vm0, 2147483647, %v244_v37  ;;  %v149_v4 = vadd.f32 %v141_v30, %v84_v39 }
  0xab   :  { %vm280_vm5 = vcmp.gt.s32.totalorder %v1407_v49, 2147483648 }
  0xac   :  { %v205_v20 = vadd.f32 %v197_v12, %v148_v11  ;;  %v194_v22 = vmul.f32 %v186_v13, %v186_v13  ;;  %v291_v2 = vsel %vm280_vm5, %v1407_v49, 2147483647 }
  0xad   :  { %vm1201_vm12 = vcmp.gt.s32.totalorder %v291_v2, 2147483647 }
  0xae   :  { %v202_v33 = vadd.f32 %v194_v22, %v145_v14  ;;  %v240_v38 = vand.u32 4294967232, %v205_v20  ;;  %v300_v13 = vsel %vm1201_vm12, 2147483647, %v291_v2  ;;  %v306_v22 = vsel %vm305_vm3, %v298_v15, %v294_v10 }
  0xb0   :  { %v237_v45 = vand.u32 4294967232, %v202_v33  ;;  %v248_v51 = vor.u32 %v240_v38, %v214_v36 }
  0xb1   :  { %v168_v44 = vpop.permute.xlu1 %167 }
  0xb2   :  { %v187_v46 = vsub.f32 %v168_v44, %v1368_v32  ;;  %v245_v58 = vor.u32 %v237_v45, %v211_v41  ;;  %v1417_v59 = vsel %vm262_vm2, 2147483647, %v248_v51 }
  0xb3   :  { %vm284_vm9 = vcmp.gt.s32.totalorder %v1417_v59, 2147483648 }
  0xb4   :  { %v195_v52 = vmul.f32 %v187_v46, %v187_v46  ;;  %v1424_v63 = vsel %vm259_vm4, 2147483647, %v245_v58  ;;  %v295_v9 = vsel %vm284_vm9, %v1417_v59, 2147483647 }
  0xb5   :  { %vm281_vm11 = vcmp.gt.s32.totalorder %v1424_v63, 2147483648  ;;  %vm307_vm1 = vcmp.lt.s32.totalorder %v300_v13, %v295_v9 }
  0xb6   :  { %v203_v23 = vadd.f32 %v195_v52, %v146_v48  ;;  %v292_v12 = vsel %vm281_vm11, %v1424_v63, 2147483647  ;;  %v308_v18 = vsel %vm307_vm1, %v300_v13, %v295_v9 }
  0xb7   :  { %vm1202_vm2 = vcmp.gt.s32.totalorder %v292_v12, 2147483647 }
  0xb8   :  { %v238_v29 = vand.u32 4294967232, %v203_v23  ;;  %v302_v20 = vsel %vm1202_vm2, 2147483647, %v292_v12 }
  0xb9   :  { %v180_v62 = vpop.permute.xlu1 %179 }
  0xba   :  { %v246_v0 = vor.u32 %v238_v29, %v212_v57  ;;  %v190_v1 = vsub.f32 %v180_v62, %v1368_v32  ;;  %v1437_v32 = vsel %vm256_vm8, 2147483647, %v242_v60 }
  0xbb   :  { %vm278_vm0 = vcmp.gt.s32.totalorder %v1437_v32, 2147483648 }
  0xbc   :  { %v1432_v5 = vsel %vm260_vm7, 2147483647, %v246_v0  ;;  %v198_v6 = vmul.f32 %v190_v1, %v190_v1  ;;  %v289_v17 = vsel %vm278_vm0, %v1437_v32, 2147483647  ;;  %vm311_vm7 = vcmp.lt.s32.totalorder %v306_v22, %v308_v18 }
  0xbd   :  { %vm282_vm13 = vcmp.gt.s32.totalorder %v1432_v5, 2147483648  ;;  %v312_v27 = vsel %vm311_vm7, %v306_v22, %v308_v18 }
  0xbe   :  { %v206_v8 = vadd.f32 %v198_v6, %v149_v4  ;;  %v293_v14 = vsel %vm282_vm13, %v1432_v5, 2147483647 }
  0xbf   :  { %vm303_vm5 = vcmp.lt.s32.totalorder %v289_v17, %v293_v14 }
  0xc0   :  { %v241_v11 = vand.u32 4294967232, %v206_v8  ;;  %v304_v24 = vsel %vm303_vm5, %v289_v17, %v293_v14 }
  0xc2   :  { %v249_v54 = vor.u32 %v241_v11, %v215_v7 }
  0xc4   :  { %v1446_v16 = vsel %vm263_vm15, 2147483647, %v249_v54 }
  0xc5   :  { %vm285_vm4 = vcmp.gt.s32.totalorder %v1446_v16, 2147483648 }
  0xc6   :  { %v296_v19 = vsel %vm285_vm4, %v1446_v16, 2147483647 }
  0xc7   :  { %vm309_vm6 = vcmp.lt.s32.totalorder %v302_v20, %v296_v19 }
  0xc8   :  { %v310_v26 = vsel %vm309_vm6, %v302_v20, %v296_v19 }
  0xc9   :  { %vm313_vm8 = vcmp.lt.s32.totalorder %v310_v26, %v304_v24 }
  0xca   :  { %v314_v28 = vsel %vm313_vm8, %v310_v26, %v304_v24 }
  0xcb   :  { %vm315_vm9 = vcmp.lt.s32.totalorder %v312_v27, %v314_v28 }
  0xcc   :  { %v316_v31 = vsel %vm315_vm9, %v312_v27, %v314_v28 }
  0xcd   :  { %v317_v33 = vrot.slane %v316_v31, 4 }
  0xcf   :  { %vm318_vm10 = vcmp.lt.s32.totalorder %v316_v31, %v317_v33 }
  0xd0   :  { %v319_v34 = vsel %vm318_vm10, %v316_v31, %v317_v33 }
  0xd1   :  { %v320_v35 = vrot.slane %v319_v34, 2 }
  0xd3   :  { %vm321_vm11 = vcmp.lt.s32.totalorder %v319_v34, %v320_v35 }
  0xd4   :  { %v322_v36 = vsel %vm321_vm11, %v319_v34, %v320_v35 }
  0xd5   :  { %v323_v25 = vrot.slane %v322_v36, 1 }
  0xd7   :  { %vm324_vm12 = vcmp.lt.s32.totalorder %v322_v36, %v323_v25 }
  0xd8   :  { %v1451_v37 = vsel %vm324_vm12, %v322_v36, %v323_v25 }
  0xd9   :  { %vm329_vm13 = vcmp.gt.s32.totalorder %v1437_v32, %v1451_v37  ;;  %vm330_vm14 = vcmp.gt.s32.totalorder %v1411_v53, %v1451_v37  ;;  %vm331_vm15 = vcmp.gt.s32.totalorder %v1407_v49, %v1451_v37  ;;  %vm332_vm0 = vcmp.gt.s32.totalorder %v1424_v63, %v1451_v37 }
  0xda   :  { %vm333_vm1 = vcmp.gt.s32.totalorder %v1432_v5, %v1451_v37  ;;  %vm334_vm2 = vcmp.gt.s32.totalorder %v1421_v61, %v1451_v37  ;;  %vm335_vm3 = vcmp.gt.s32.totalorder %v1417_v59, %v1451_v37  ;;  %v340_v38 = vsel %vm329_vm13, %v1437_v32, 2147483647 }
  0xdb   :  { %v341_v40 = vsel %vm330_vm14, %v1411_v53, 2147483647  ;;  %v342_v42 = vsel %vm331_vm15, %v1407_v49, 2147483647  ;;  %vm336_vm4 = vcmp.gt.s32.totalorder %v1446_v16, %v1451_v37  ;;  %v343_v43 = vsel %vm332_vm0, %v1424_v63, 2147483647 }
  0xdc   :  { %v344_v21 = vsel %vm333_vm1, %v1432_v5, 2147483647  ;;  %v345_v44 = vsel %vm334_vm2, %v1421_v61, 2147483647  ;;  %v346_v41 = vsel %vm335_vm3, %v1417_v59, 2147483647 }
  0xdd   :  { %vm1204_vm5 = vcmp.gt.s32.totalorder %v341_v40, 2147483647  ;;  %vm1205_vm6 = vcmp.gt.s32.totalorder %v342_v42, 2147483647  ;;  %vm1206_vm7 = vcmp.gt.s32.totalorder %v343_v43, 2147483647  ;;  %vm354_vm8 = vcmp.lt.s32.totalorder %v340_v38, %v344_v21 }
  0xde   :  { %v349_v45 = vsel %vm1204_vm5, 2147483647, %v341_v40  ;;  %v347_v46 = vsel %vm336_vm4, %v1446_v16, 2147483647  ;;  %v351_v47 = vsel %vm1205_vm6, 2147483647, %v342_v42  ;;  %v355_v51 = vsel %vm354_vm8, %v340_v38, %v344_v21 }
  0xdf   :  { %v353_v48 = vsel %vm1206_vm7, 2147483647, %v343_v43  ;;  %vm356_vm9 = vcmp.lt.s32.totalorder %v349_v45, %v345_v44  ;;  %vm358_vm10 = vcmp.lt.s32.totalorder %v351_v47, %v346_v41 }
  0xe0   :  { %v357_v50 = vsel %vm356_vm9, %v349_v45, %v345_v44  ;;  %vm360_vm11 = vcmp.lt.s32.totalorder %v353_v48, %v347_v46  ;;  %v359_v52 = vsel %vm358_vm10, %v351_v47, %v346_v41 }
  0xe1   :  { %v361_v55 = vsel %vm360_vm11, %v353_v48, %v347_v46  ;;  %vm362_vm12 = vcmp.lt.s32.totalorder %v357_v50, %v359_v52 }
  0xe2   :  { %vm364_vm13 = vcmp.lt.s32.totalorder %v361_v55, %v355_v51  ;;  %v363_v56 = vsel %vm362_vm12, %v357_v50, %v359_v52 }
  0xe3   :  { %v365_v57 = vsel %vm364_vm13, %v361_v55, %v355_v51 }
  0xe4   :  { %vm366_vm14 = vcmp.lt.s32.totalorder %v363_v56, %v365_v57 }
  0xe5   :  { %v367_v58 = vsel %vm366_vm14, %v363_v56, %v365_v57 }
  0xe6   :  { %v368_v23 = vrot.slane %v367_v58, 4 }
  0xe8   :  { %vm369_vm15 = vcmp.lt.s32.totalorder %v367_v58, %v368_v23 }
  0xe9   :  { %v370_v30 = vsel %vm369_vm15, %v367_v58, %v368_v23 }
  0xea   :  { %v371_v29 = vrot.slane %v370_v30, 2 }
  0xec   :  { %vm372_vm0 = vcmp.lt.s32.totalorder %v370_v30, %v371_v29 }
  0xed   :  { %v373_v39 = vsel %vm372_vm0, %v370_v30, %v371_v29 }
  0xee   :  { %v374_v60 = vrot.slane %v373_v39, 1 }
  0xf0   :  { %vm375_vm1 = vcmp.lt.s32.totalorder %v373_v39, %v374_v60 }
  0xf1   :  { %v376_v62 = vsel %vm375_vm1, %v373_v39, %v374_v60 }
  0xf2   :  { %vm380_vm2 = vcmp.gt.s32.totalorder %v1437_v32, %v376_v62  ;;  %vm381_vm3 = vcmp.gt.s32.totalorder %v1411_v53, %v376_v62  ;;  %vm382_vm4 = vcmp.gt.s32.totalorder %v1407_v49, %v376_v62  ;;  %vm383_vm5 = vcmp.gt.s32.totalorder %v1424_v63, %v376_v62 }
  0xf3   :  { %vm384_vm6 = vcmp.gt.s32.totalorder %v1432_v5, %v376_v62  ;;  %vm385_vm7 = vcmp.gt.s32.totalorder %v1421_v61, %v376_v62  ;;  %vm386_vm8 = vcmp.gt.s32.totalorder %v1417_v59, %v376_v62  ;;  %v391_v0 = vsel %vm380_vm2, %v1437_v32, 2147483647 }
  0xf4   :  { %v392_v1 = vsel %vm381_vm3, %v1411_v53, 2147483647  ;;  %v393_v2 = vsel %vm382_vm4, %v1407_v49, 2147483647  ;;  %vm387_vm9 = vcmp.gt.s32.totalorder %v1446_v16, %v376_v62  ;;  %v394_v3 = vsel %vm383_vm5, %v1424_v63, 2147483647 }
  0xf5   :  { %v395_v4 = vsel %vm384_vm6, %v1432_v5, 2147483647  ;;  %v396_v6 = vsel %vm385_vm7, %v1421_v61, 2147483647  ;;  %v397_v7 = vsel %vm386_vm8, %v1417_v59, 2147483647 }
  0xf6   :  { %vm1208_vm10 = vcmp.gt.s32.totalorder %v392_v1, 2147483647  ;;  %vm1209_vm11 = vcmp.gt.s32.totalorder %v393_v2, 2147483647  ;;  %vm1210_vm12 = vcmp.gt.s32.totalorder %v394_v3, 2147483647  ;;  %vm405_vm13 = vcmp.lt.s32.totalorder %v391_v0, %v395_v4 }
  0xf7   :  { %v400_v8 = vsel %vm1208_vm10, 2147483647, %v392_v1  ;;  %v398_v9 = vsel %vm387_vm9, %v1446_v16, 2147483647  ;;  %v402_v10 = vsel %vm1209_vm11, 2147483647, %v393_v2  ;;  %v406_v13 = vsel %vm405_vm13, %v391_v0, %v395_v4 }
  0xf8   :  { %v404_v11 = vsel %vm1210_vm12, 2147483647, %v394_v3  ;;  %vm407_vm14 = vcmp.lt.s32.totalorder %v400_v8, %v396_v6  ;;  %vm409_vm15 = vcmp.lt.s32.totalorder %v402_v10, %v397_v7  ;;  %vm1142_vm4 = vcmask 1040384  }
  0xf9   :  { %v408_v12 = vsel %vm407_vm14, %v400_v8, %v396_v6  ;;  %vm411_vm0 = vcmp.lt.s32.totalorder %v404_v11, %v398_v9  ;;  %v410_v54 = vsel %vm409_vm15, %v402_v10, %v397_v7  ;;  %v1143_v20 = vsel %vm1142_vm4, %v1451_v37, %v376_v62 }
  0xfa   :  { %v412_v14 = vsel %vm411_vm0, %v404_v11, %v398_v9  ;;  %vm413_vm1 = vcmp.lt.s32.totalorder %v408_v12, %v410_v54 }
  0xfb   :  { %vm415_vm2 = vcmp.lt.s32.totalorder %v412_v14, %v406_v13  ;;  %v414_v15 = vsel %vm413_vm1, %v408_v12, %v410_v54 }
  0xfc   :  { %v416_v17 = vsel %vm415_vm2, %v412_v14, %v406_v13 }
  0xfd   :  { %vm417_vm3 = vcmp.lt.s32.totalorder %v414_v15, %v416_v17 }
  0xfe   :  { %v418_v18 = vsel %vm417_vm3, %v414_v15, %v416_v17 }
  0xff   :  { %v419_v19 = vrot.slane %v418_v18, 4 }
 0x101   :  { %vm420_vm5 = vcmp.lt.s32.totalorder %v418_v18, %v419_v19 }
 0x102   :  { %v421_v22 = vsel %vm420_vm5, %v418_v18, %v419_v19 }
 0x103   :  { %v422_v24 = vrot.slane %v421_v22, 2 }
 0x105   :  { %vm423_vm6 = vcmp.lt.s32.totalorder %v421_v22, %v422_v24 }
 0x106   :  { %v424_v26 = vsel %vm423_vm6, %v421_v22, %v422_v24 }
 0x107   :  { %v425_v27 = vrot.slane %v424_v26, 1 }
 0x109   :  { %vm426_vm7 = vcmp.lt.s32.totalorder %v424_v26, %v425_v27 }
 0x10a   :  { %v427_v28 = vsel %vm426_vm7, %v424_v26, %v425_v27 }
 0x10b   :  { %vm431_vm8 = vcmp.gt.s32.totalorder %v1437_v32, %v427_v28  ;;  %vm432_vm9 = vcmp.gt.s32.totalorder %v1411_v53, %v427_v28  ;;  %vm433_vm10 = vcmp.gt.s32.totalorder %v1407_v49, %v427_v28  ;;  %vm434_vm11 = vcmp.gt.s32.totalorder %v1424_v63, %v427_v28 }
 0x10c   :  { %vm435_vm12 = vcmp.gt.s32.totalorder %v1432_v5, %v427_v28  ;;  %vm436_vm13 = vcmp.gt.s32.totalorder %v1421_v61, %v427_v28  ;;  %vm437_vm14 = vcmp.gt.s32.totalorder %v1417_v59, %v427_v28  ;;  %v442_v31 = vsel %vm431_vm8, %v1437_v32, 2147483647 }
 0x10d   :  { %v443_v33 = vsel %vm432_vm9, %v1411_v53, 2147483647  ;;  %v444_v34 = vsel %vm433_vm10, %v1407_v49, 2147483647  ;;  %vm438_vm15 = vcmp.gt.s32.totalorder %v1446_v16, %v427_v28  ;;  %v445_v35 = vsel %vm434_vm11, %v1424_v63, 2147483647 }
 0x10e   :  { %v446_v36 = vsel %vm435_vm12, %v1432_v5, 2147483647  ;;  %v447_v25 = vsel %vm436_vm13, %v1421_v61, 2147483647  ;;  %v448_v37 = vsel %vm437_vm14, %v1417_v59, 2147483647 }
 0x10f   :  { %vm1212_vm0 = vcmp.gt.s32.totalorder %v443_v33, 2147483647  ;;  %vm1213_vm1 = vcmp.gt.s32.totalorder %v444_v34, 2147483647  ;;  %vm1214_vm2 = vcmp.gt.s32.totalorder %v445_v35, 2147483647  ;;  %vm456_vm3 = vcmp.lt.s32.totalorder %v442_v31, %v446_v36 }
 0x110   :  { %v451_v38 = vsel %vm1212_vm0, 2147483647, %v443_v33  ;;  %v449_v40 = vsel %vm438_vm15, %v1446_v16, 2147483647  ;;  %v453_v42 = vsel %vm1213_vm1, 2147483647, %v444_v34  ;;  %v457_v44 = vsel %vm456_vm3, %v442_v31, %v446_v36 }
 0x111   :  { %v455_v43 = vsel %vm1214_vm2, 2147483647, %v445_v35  ;;  %vm458_vm5 = vcmp.lt.s32.totalorder %v451_v38, %v447_v25  ;;  %vm460_vm6 = vcmp.lt.s32.totalorder %v453_v42, %v448_v37  ;;  %vm1144_vm10 = vcmask 1041408  }
 0x112   :  { %v459_v21 = vsel %vm458_vm5, %v451_v38, %v447_v25  ;;  %vm462_vm7 = vcmp.lt.s32.totalorder %v455_v43, %v449_v40  ;;  %v461_v41 = vsel %vm460_vm6, %v453_v42, %v448_v37  ;;  %v1145_v48 = vsel %vm1144_vm10, %v1143_v20, %v427_v28 }
 0x113   :  { %v463_v45 = vsel %vm462_vm7, %v455_v43, %v449_v40  ;;  %vm464_vm8 = vcmp.lt.s32.totalorder %v459_v21, %v461_v41 }
 0x114   :  { %vm466_vm9 = vcmp.lt.s32.totalorder %v463_v45, %v457_v44  ;;  %v465_v46 = vsel %vm464_vm8, %v459_v21, %v461_v41 }
 0x115   :  { %v467_v47 = vsel %vm466_vm9, %v463_v45, %v457_v44 }
 0x116   :  { %vm468_vm11 = vcmp.lt.s32.totalorder %v465_v46, %v467_v47 }
 0x117   :  { %v469_v50 = vsel %vm468_vm11, %v465_v46, %v467_v47 }
 0x118   :  { %v470_v51 = vrot.slane %v469_v50, 4 }
 0x11a   :  { %vm471_vm12 = vcmp.lt.s32.totalorder %v469_v50, %v470_v51 }
 0x11b   :  { %v472_v52 = vsel %vm471_vm12, %v469_v50, %v470_v51 }
 0x11c   :  { %v473_v55 = vrot.slane %v472_v52, 2 }
 0x11e   :  { %vm474_vm13 = vcmp.lt.s32.totalorder %v472_v52, %v473_v55 }
 0x11f   :  { %v475_v56 = vsel %vm474_vm13, %v472_v52, %v473_v55 }
 0x120   :  { %v476_v57 = vrot.slane %v475_v56, 1 }
 0x122   :  { %vm477_vm14 = vcmp.lt.s32.totalorder %v475_v56, %v476_v57 }
 0x123   :  { %v478_v58 = vsel %vm477_vm14, %v475_v56, %v476_v57  ;;  %vm1146_vm14 = vcmask 1042432  }
 0x124   :  { %vm482_vm15 = vcmp.gt.s32.totalorder %v1437_v32, %v478_v58  ;;  %vm483_vm0 = vcmp.gt.s32.totalorder %v1411_v53, %v478_v58  ;;  %vm484_vm1 = vcmp.gt.s32.totalorder %v1407_v49, %v478_v58  ;;  %vm485_vm2 = vcmp.gt.s32.totalorder %v1424_v63, %v478_v58 }
 0x125   :  { %vm486_vm3 = vcmp.gt.s32.totalorder %v1432_v5, %v478_v58  ;;  %vm487_vm5 = vcmp.gt.s32.totalorder %v1421_v61, %v478_v58  ;;  %vm488_vm6 = vcmp.gt.s32.totalorder %v1417_v59, %v478_v58  ;;  %vm489_vm7 = vcmp.gt.s32.totalorder %v1446_v16, %v478_v58 }
 0x126   :  { %v493_v23 = vsel %vm482_vm15, %v1437_v32, 2147483647  ;;  %v494_v30 = vsel %vm483_vm0, %v1411_v53, 2147483647  ;;  %v495_v29 = vsel %vm484_vm1, %v1407_v49, 2147483647  ;;  %v1529_v7 = vsel %vm1146_vm14, %v1145_v48, %v478_v58 }
 0x127   :  { %v496_v39 = vsel %vm485_vm2, %v1424_v63, 2147483647  ;;  %v497_v60 = vsel %vm486_vm3, %v1432_v5, 2147483647  ;;  %v498_v62 = vsel %vm487_vm5, %v1421_v61, 2147483647 }
 0x128   :  { %v499_v0 = vsel %vm488_vm6, %v1417_v59, 2147483647  ;;  %v500_v1 = vsel %vm489_vm7, %v1446_v16, 2147483647  ;;  %vm1216_vm8 = vcmp.gt.s32.totalorder %v494_v30, 2147483647  ;;  %vm507_vm12 = vcmp.lt.s32.totalorder %v493_v23, %v497_v60 }
 0x129   :  { %v502_v2 = vsel %vm1216_vm8, 2147483647, %v494_v30  ;;  %vm1217_vm9 = vcmp.gt.s32.totalorder %v495_v29, 2147483647  ;;  %vm1218_vm11 = vcmp.gt.s32.totalorder %v496_v39, 2147483647  ;;  %v508_v8 = vsel %vm507_vm12, %v493_v23, %v497_v60 }
 0x12a   :  { %v504_v3 = vsel %vm1217_vm9, 2147483647, %v495_v29  ;;  %v506_v4 = vsel %vm1218_vm11, 2147483647, %v496_v39  ;;  %vm509_vm13 = vcmp.lt.s32.totalorder %v502_v2, %v498_v62 }
 0x12b   :  { %v510_v6 = vsel %vm509_vm13, %v502_v2, %v498_v62  ;;  %vm511_vm15 = vcmp.lt.s32.totalorder %v504_v3, %v499_v0  ;;  %vm513_vm0 = vcmp.lt.s32.totalorder %v506_v4, %v500_v1 }
 0x12c   :  { %v512_v9 = vsel %vm511_vm15, %v504_v3, %v499_v0  ;;  %v514_v10 = vsel %vm513_vm0, %v506_v4, %v500_v1 }
 0x12d   :  { %vm515_vm1 = vcmp.lt.s32.totalorder %v510_v6, %v512_v9  ;;  %vm517_vm2 = vcmp.lt.s32.totalorder %v514_v10, %v508_v8 }
 0x12e   :  { %v516_v11 = vsel %vm515_vm1, %v510_v6, %v512_v9  ;;  %v518_v12 = vsel %vm517_vm2, %v514_v10, %v508_v8 }
 0x12f   :  { %vm519_vm3 = vcmp.lt.s32.totalorder %v516_v11, %v518_v12 }
 0x130   :  { %v520_v13 = vsel %vm519_vm3, %v516_v11, %v518_v12 }
 0x131   :  { %v521_v54 = vrot.slane %v520_v13, 4 }
 0x133   :  { %vm522_vm5 = vcmp.lt.s32.totalorder %v520_v13, %v521_v54 }
 0x134   :  { %v523_v14 = vsel %vm522_vm5, %v520_v13, %v521_v54 }
 0x135   :  { %v524_v15 = vrot.slane %v523_v14, 2 }
 0x137   :  { %vm525_vm6 = vcmp.lt.s32.totalorder %v523_v14, %v524_v15 }
 0x138   :  { %v526_v17 = vsel %vm525_vm6, %v523_v14, %v524_v15 }
 0x139   :  { %v527_v18 = vrot.slane %v526_v17, 1 }
 0x13b   :  { %vm528_vm7 = vcmp.lt.s32.totalorder %v526_v17, %v527_v18 }
 0x13c   :  { %v1531_v19 = vsel %vm528_vm7, %v526_v17, %v527_v18 }
 0x13d   :  { %vm533_vm8 = vcmp.gt.s32.totalorder %v1437_v32, %v1531_v19  ;;  %vm534_vm9 = vcmp.gt.s32.totalorder %v1411_v53, %v1531_v19  ;;  %vm535_vm11 = vcmp.gt.s32.totalorder %v1407_v49, %v1531_v19  ;;  %vm536_vm12 = vcmp.gt.s32.totalorder %v1424_v63, %v1531_v19 }
 0x13e   :  { %vm537_vm13 = vcmp.gt.s32.totalorder %v1432_v5, %v1531_v19  ;;  %vm538_vm15 = vcmp.gt.s32.totalorder %v1421_v61, %v1531_v19  ;;  %vm539_vm0 = vcmp.gt.s32.totalorder %v1417_v59, %v1531_v19  ;;  %v544_v20 = vsel %vm533_vm8, %v1437_v32, 2147483647 }
 0x13f   :  { %v545_v22 = vsel %vm534_vm9, %v1411_v53, 2147483647  ;;  %v546_v24 = vsel %vm535_vm11, %v1407_v49, 2147483647  ;;  %vm540_vm1 = vcmp.gt.s32.totalorder %v1446_v16, %v1531_v19  ;;  %v547_v26 = vsel %vm536_vm12, %v1424_v63, 2147483647 }
 0x140   :  { %v548_v27 = vsel %vm537_vm13, %v1432_v5, 2147483647  ;;  %v549_v28 = vsel %vm538_vm15, %v1421_v61, 2147483647  ;;  %v550_v31 = vsel %vm539_vm0, %v1417_v59, 2147483647 }
 0x141   :  { %vm1220_vm2 = vcmp.gt.s32.totalorder %v545_v22, 2147483647  ;;  %vm1221_vm3 = vcmp.gt.s32.totalorder %v546_v24, 2147483647  ;;  %vm1222_vm5 = vcmp.gt.s32.totalorder %v547_v26, 2147483647  ;;  %vm558_vm6 = vcmp.lt.s32.totalorder %v544_v20, %v548_v27 }
 0x142   :  { %v553_v33 = vsel %vm1220_vm2, 2147483647, %v545_v22  ;;  %v551_v34 = vsel %vm540_vm1, %v1446_v16, 2147483647  ;;  %v555_v35 = vsel %vm1221_vm3, 2147483647, %v546_v24  ;;  %v559_v37 = vsel %vm558_vm6, %v544_v20, %v548_v27 }
 0x143   :  { %v557_v36 = vsel %vm1222_vm5, 2147483647, %v547_v26  ;;  %vm560_vm7 = vcmp.lt.s32.totalorder %v553_v33, %v549_v28  ;;  %vm562_vm8 = vcmp.lt.s32.totalorder %v555_v35, %v550_v31 }
 0x144   :  { %v561_v25 = vsel %vm560_vm7, %v553_v33, %v549_v28  ;;  %vm564_vm9 = vcmp.lt.s32.totalorder %v557_v36, %v551_v34  ;;  %v563_v38 = vsel %vm562_vm8, %v555_v35, %v550_v31 }
 0x145   :  { %v565_v40 = vsel %vm564_vm9, %v557_v36, %v551_v34  ;;  %vm566_vm11 = vcmp.lt.s32.totalorder %v561_v25, %v563_v38 }
 0x146   :  { %vm568_vm12 = vcmp.lt.s32.totalorder %v565_v40, %v559_v37  ;;  %v567_v42 = vsel %vm566_vm11, %v561_v25, %v563_v38 }
 0x147   :  { %v569_v43 = vsel %vm568_vm12, %v565_v40, %v559_v37 }
 0x148   :  { %vm570_vm13 = vcmp.lt.s32.totalorder %v567_v42, %v569_v43 }
 0x149   :  { %v571_v21 = vsel %vm570_vm13, %v567_v42, %v569_v43 }
 0x14a   :  { %v572_v44 = vrot.slane %v571_v21, 4 }
 0x14c   :  { %vm573_vm15 = vcmp.lt.s32.totalorder %v571_v21, %v572_v44 }
 0x14d   :  { %v574_v41 = vsel %vm573_vm15, %v571_v21, %v572_v44 }
 0x14e   :  { %v575_v45 = vrot.slane %v574_v41, 2 }
 0x150   :  { %vm576_vm0 = vcmp.lt.s32.totalorder %v574_v41, %v575_v45 }
 0x151   :  { %v577_v46 = vsel %vm576_vm0, %v574_v41, %v575_v45 }
 0x152   :  { %v578_v47 = vrot.slane %v577_v46, 1 }
 0x154   :  { %vm579_vm1 = vcmp.lt.s32.totalorder %v577_v46, %v578_v47 }
 0x155   :  { %v1557_v48 = vsel %vm579_vm1, %v577_v46, %v578_v47 }
 0x156   :  { %vm584_vm2 = vcmp.gt.s32.totalorder %v1437_v32, %v1557_v48  ;;  %vm585_vm3 = vcmp.gt.s32.totalorder %v1411_v53, %v1557_v48  ;;  %vm586_vm5 = vcmp.gt.s32.totalorder %v1407_v49, %v1557_v48  ;;  %vm587_vm6 = vcmp.gt.s32.totalorder %v1424_v63, %v1557_v48 }
 0x157   :  { %vm588_vm7 = vcmp.gt.s32.totalorder %v1432_v5, %v1557_v48  ;;  %vm589_vm8 = vcmp.gt.s32.totalorder %v1421_v61, %v1557_v48  ;;  %vm590_vm9 = vcmp.gt.s32.totalorder %v1417_v59, %v1557_v48  ;;  %v595_v50 = vsel %vm584_vm2, %v1437_v32, 2147483647 }
 0x158   :  { %v596_v51 = vsel %vm585_vm3, %v1411_v53, 2147483647  ;;  %v597_v52 = vsel %vm586_vm5, %v1407_v49, 2147483647  ;;  %vm591_vm11 = vcmp.gt.s32.totalorder %v1446_v16, %v1557_v48  ;;  %v598_v55 = vsel %vm587_vm6, %v1424_v63, 2147483647 }
 0x159   :  { %v599_v56 = vsel %vm588_vm7, %v1432_v5, 2147483647  ;;  %v600_v57 = vsel %vm589_vm8, %v1421_v61, 2147483647  ;;  %v601_v58 = vsel %vm590_vm9, %v1417_v59, 2147483647 }
 0x15a   :  { %vm1224_vm12 = vcmp.gt.s32.totalorder %v596_v51, 2147483647  ;;  %vm1225_vm13 = vcmp.gt.s32.totalorder %v597_v52, 2147483647  ;;  %vm1226_vm15 = vcmp.gt.s32.totalorder %v598_v55, 2147483647  ;;  %vm609_vm0 = vcmp.lt.s32.totalorder %v595_v50, %v599_v56 }
 0x15b   :  { %v604_v23 = vsel %vm1224_vm12, 2147483647, %v596_v51  ;;  %v602_v30 = vsel %vm591_vm11, %v1446_v16, 2147483647  ;;  %v606_v29 = vsel %vm1225_vm13, 2147483647, %v597_v52  ;;  %v610_v62 = vsel %vm609_vm0, %v595_v50, %v599_v56 }
 0x15c   :  { %v608_v39 = vsel %vm1226_vm15, 2147483647, %v598_v55  ;;  %vm611_vm1 = vcmp.lt.s32.totalorder %v604_v23, %v600_v57  ;;  %vm613_vm2 = vcmp.lt.s32.totalorder %v606_v29, %v601_v58 }
 0x15d   :  { %v612_v60 = vsel %vm611_vm1, %v604_v23, %v600_v57  ;;  %vm615_vm3 = vcmp.lt.s32.totalorder %v608_v39, %v602_v30  ;;  %v614_v0 = vsel %vm613_vm2, %v606_v29, %v601_v58 }
 0x15e   :  { %v616_v1 = vsel %vm615_vm3, %v608_v39, %v602_v30  ;;  %vm617_vm5 = vcmp.lt.s32.totalorder %v612_v60, %v614_v0 }
 0x15f   :  { %vm619_vm6 = vcmp.lt.s32.totalorder %v616_v1, %v610_v62  ;;  %v618_v2 = vsel %vm617_vm5, %v612_v60, %v614_v0 }
 0x160   :  { %v620_v3 = vsel %vm619_vm6, %v616_v1, %v610_v62 }
 0x161   :  { %vm621_vm7 = vcmp.lt.s32.totalorder %v618_v2, %v620_v3 }
 0x162   :  { %v622_v4 = vsel %vm621_vm7, %v618_v2, %v620_v3 }
 0x163   :  { %v623_v6 = vrot.slane %v622_v4, 4 }
 0x165   :  { %vm624_vm8 = vcmp.lt.s32.totalorder %v622_v4, %v623_v6 }
 0x166   :  { %v625_v8 = vsel %vm624_vm8, %v622_v4, %v623_v6 }
 0x167   :  { %v626_v9 = vrot.slane %v625_v8, 2 }
 0x169   :  { %vm627_vm9 = vcmp.lt.s32.totalorder %v625_v8, %v626_v9 }
 0x16a   :  { %v628_v10 = vsel %vm627_vm9, %v625_v8, %v626_v9 }
 0x16b   :  { %v629_v11 = vrot.slane %v628_v10, 1 }
 0x16d   :  { %vm630_vm11 = vcmp.lt.s32.totalorder %v628_v10, %v629_v11 }
 0x16e   :  { %v1583_v12 = vsel %vm630_vm11, %v628_v10, %v629_v11 }
 0x16f   :  { %vm635_vm12 = vcmp.gt.s32.totalorder %v1437_v32, %v1583_v12  ;;  %vm636_vm13 = vcmp.gt.s32.totalorder %v1411_v53, %v1583_v12  ;;  %vm637_vm15 = vcmp.gt.s32.totalorder %v1407_v49, %v1583_v12  ;;  %vm638_vm0 = vcmp.gt.s32.totalorder %v1424_v63, %v1583_v12 }
 0x170   :  { %vm639_vm1 = vcmp.gt.s32.totalorder %v1432_v5, %v1583_v12  ;;  %vm640_vm2 = vcmp.gt.s32.totalorder %v1421_v61, %v1583_v12  ;;  %vm641_vm3 = vcmp.gt.s32.totalorder %v1417_v59, %v1583_v12  ;;  %v646_v13 = vsel %vm635_vm12, %v1437_v32, 2147483647 }
 0x171   :  { %v647_v54 = vsel %vm636_vm13, %v1411_v53, 2147483647  ;;  %v648_v14 = vsel %vm637_vm15, %v1407_v49, 2147483647  ;;  %vm642_vm5 = vcmp.gt.s32.totalorder %v1446_v16, %v1583_v12  ;;  %v649_v15 = vsel %vm638_vm0, %v1424_v63, 2147483647 }
 0x172   :  { %v650_v17 = vsel %vm639_vm1, %v1432_v5, 2147483647  ;;  %v651_v18 = vsel %vm640_vm2, %v1421_v61, 2147483647  ;;  %v652_v20 = vsel %vm641_vm3, %v1417_v59, 2147483647 }
 0x173   :  { %vm1228_vm6 = vcmp.gt.s32.totalorder %v647_v54, 2147483647  ;;  %vm1229_vm7 = vcmp.gt.s32.totalorder %v648_v14, 2147483647  ;;  %vm1230_vm8 = vcmp.gt.s32.totalorder %v649_v15, 2147483647  ;;  %vm660_vm9 = vcmp.lt.s32.totalorder %v646_v13, %v650_v17 }
 0x174   :  { %v655_v22 = vsel %vm1228_vm6, 2147483647, %v647_v54  ;;  %v653_v24 = vsel %vm642_vm5, %v1446_v16, 2147483647  ;;  %v657_v26 = vsel %vm1229_vm7, 2147483647, %v648_v14  ;;  %v661_v31 = vsel %vm660_vm9, %v646_v13, %v650_v17 }
 0x175   :  { %v659_v27 = vsel %vm1230_vm8, 2147483647, %v649_v15  ;;  %vm662_vm11 = vcmp.lt.s32.totalorder %v655_v22, %v651_v18  ;;  %vm664_vm12 = vcmp.lt.s32.totalorder %v657_v26, %v652_v20  ;;  %vm1148_vm5 = vcmask 1043456  }
 0x176   :  { %v663_v28 = vsel %vm662_vm11, %v655_v22, %v651_v18  ;;  %vm666_vm13 = vcmp.lt.s32.totalorder %v659_v27, %v653_v24  ;;  %v665_v33 = vsel %vm664_vm12, %v657_v26, %v652_v20  ;;  %vm1797_vm6 = vcmask 1044480  }
 0x177   :  { %v667_v34 = vsel %vm666_vm13, %v659_v27, %v653_v24  ;;  %vm668_vm15 = vcmp.lt.s32.totalorder %v663_v28, %v665_v33  ;;  %v1149_v21 = vsel %vm1148_vm5, %v1529_v7, %v1531_v19  ;;  %vm1795_vm8 = vcmask 1045504  }
 0x178   :  { %vm670_vm0 = vcmp.lt.s32.totalorder %v667_v34, %v661_v31  ;;  %v669_v35 = vsel %vm668_vm15, %v663_v28, %v665_v33  ;;  %v1151_v41 = vsel %vm1797_vm6, %v1149_v21, %v1557_v48  ;;  %vm1796_vm9 = vcmask 1046528  }
 0x179   :  { %v671_v36 = vsel %vm670_vm0, %v667_v34, %v661_v31  ;;  %v1153_v46 = vsel %vm1795_vm8, %v1151_v41, %v1583_v12 }
 0x17a   :  { %vm672_vm1 = vcmp.lt.s32.totalorder %v669_v35, %v671_v36 }
 0x17b   :  { %v673_v25 = vsel %vm672_vm1, %v669_v35, %v671_v36 }
 0x17c   :  { %v674_v37 = vrot.slane %v673_v25, 4 }
 0x17e   :  { %vm675_vm2 = vcmp.lt.s32.totalorder %v673_v25, %v674_v37 }
 0x17f   :  { %v676_v38 = vsel %vm675_vm2, %v673_v25, %v674_v37 }
 0x180   :  { %v677_v40 = vrot.slane %v676_v38, 2 }
 0x182   :  { %vm678_vm3 = vcmp.lt.s32.totalorder %v676_v38, %v677_v40 }
 0x183   :  { %v679_v42 = vsel %vm678_vm3, %v676_v38, %v677_v40 }
 0x184   :  { %v680_v43 = vrot.slane %v679_v42, 1 }
 0x186   :  { %vm681_vm7 = vcmp.lt.s32.totalorder %v679_v42, %v680_v43 }
 0x187   :  { %v682_v44 = vsel %vm681_vm7, %v679_v42, %v680_v43 }
 0x188   :  { %vm686_vm11 = vcmp.gt.s32.totalorder %v1437_v32, %v682_v44  ;;  %vm687_vm12 = vcmp.gt.s32.totalorder %v1411_v53, %v682_v44  ;;  %vm688_vm13 = vcmp.gt.s32.totalorder %v1407_v49, %v682_v44  ;;  %vm689_vm15 = vcmp.gt.s32.totalorder %v1424_v63, %v682_v44 }
 0x189   :  { %vm690_vm0 = vcmp.gt.s32.totalorder %v1432_v5, %v682_v44  ;;  %vm691_vm1 = vcmp.gt.s32.totalorder %v1421_v61, %v682_v44  ;;  %vm692_vm2 = vcmp.gt.s32.totalorder %v1417_v59, %v682_v44  ;;  %vm693_vm3 = vcmp.gt.s32.totalorder %v1446_v16, %v682_v44 }
 0x18a   :  { %v697_v7 = vsel %vm686_vm11, %v1437_v32, 2147483647  ;;  %v698_v19 = vsel %vm687_vm12, %v1411_v53, 2147483647  ;;  %v699_v45 = vsel %vm688_vm13, %v1407_v49, 2147483647  ;;  %v1155_v51 = vsel %vm1796_vm9, %v1153_v46, %v682_v44 }
 0x18b   :  { %v700_v47 = vsel %vm689_vm15, %v1424_v63, 2147483647  ;;  %v701_v48 = vsel %vm690_vm0, %v1432_v5, 2147483647  ;;  %v702_v50 = vsel %vm691_vm1, %v1421_v61, 2147483647 }
 0x18c   :  { %v703_v52 = vsel %vm692_vm2, %v1417_v59, 2147483647  ;;  %v704_v55 = vsel %vm693_vm3, %v1446_v16, 2147483647  ;;  %vm1232_vm7 = vcmp.gt.s32.totalorder %v698_v19, 2147483647  ;;  %vm711_vm13 = vcmp.lt.s32.totalorder %v697_v7, %v701_v48 }
 0x18d   :  { %v706_v56 = vsel %vm1232_vm7, 2147483647, %v698_v19  ;;  %vm1233_vm11 = vcmp.gt.s32.totalorder %v699_v45, 2147483647  ;;  %vm1234_vm12 = vcmp.gt.s32.totalorder %v700_v47, 2147483647  ;;  %v712_v29 = vsel %vm711_vm13, %v697_v7, %v701_v48 }
 0x18e   :  { %v708_v57 = vsel %vm1233_vm11, 2147483647, %v699_v45  ;;  %v710_v58 = vsel %vm1234_vm12, 2147483647, %v700_v47  ;;  %vm713_vm8 = vcmp.lt.s32.totalorder %v706_v56, %v702_v50  ;;  %v1176_v23 = vand.u32 63, %v1155_v51 }
 0x18f   :  { %v714_v30 = vsel %vm713_vm8, %v706_v56, %v702_v50  ;;  %vm715_vm15 = vcmp.lt.s32.totalorder %v708_v57, %v703_v52  ;;  %vm717_vm0 = vcmp.lt.s32.totalorder %v710_v58, %v704_v55 }
 0x190   :  { %v716_v39 = vsel %vm715_vm15, %v708_v57, %v703_v52  ;;  %v718_v60 = vsel %vm717_vm0, %v710_v58, %v704_v55  ;;  %1179 = vst [vmem:[#allocation3] sm:$0xff] %v1176_v23 }
 0x191   :  { %vm719_vm1 = vcmp.lt.s32.totalorder %v714_v30, %v716_v39  ;;  %vm721_vm2 = vcmp.lt.s32.totalorder %v718_v60, %v712_v29 }
 0x192   :  { %v720_v62 = vsel %vm719_vm1, %v714_v30, %v716_v39  ;;  %v722_v0 = vsel %vm721_vm2, %v718_v60, %v712_v29 }
 0x193   :  { %vm723_vm3 = vcmp.lt.s32.totalorder %v720_v62, %v722_v0 }
 0x194   :  { %v724_v1 = vsel %vm723_vm3, %v720_v62, %v722_v0 }
 0x195   :  { %v725_v2 = vrot.slane %v724_v1, 4 }
 0x197   :  { %vm726_vm7 = vcmp.lt.s32.totalorder %v724_v1, %v725_v2 }
 0x198   :  { %v727_v3 = vsel %vm726_vm7, %v724_v1, %v725_v2 }
 0x199   :  { %v728_v4 = vrot.slane %v727_v3, 2 }
 0x19b   :  { %vm729_vm11 = vcmp.lt.s32.totalorder %v727_v3, %v728_v4 }
 0x19c   :  { %v730_v6 = vsel %vm729_vm11, %v727_v3, %v728_v4 }
 0x19d   :  { %v731_v8 = vrot.slane %v730_v6, 1 }
 0x19f   :  { %vm732_vm8 = vcmp.lt.s32.totalorder %v730_v6, %v731_v8 }
 0x1a0   :  { %v733_v9 = vsel %vm732_vm8, %v730_v6, %v731_v8 }
 0x1a1   :  { %vm737_vm12 = vcmp.gt.s32.totalorder %v1437_v32, %v733_v9  ;;  %vm738_vm13 = vcmp.gt.s32.totalorder %v1411_v53, %v733_v9  ;;  %vm739_vm15 = vcmp.gt.s32.totalorder %v1407_v49, %v733_v9  ;;  %vm740_vm0 = vcmp.gt.s32.totalorder %v1424_v63, %v733_v9 }
 0x1a2   :  { %vm741_vm1 = vcmp.gt.s32.totalorder %v1432_v5, %v733_v9  ;;  %vm742_vm2 = vcmp.gt.s32.totalorder %v1421_v61, %v733_v9  ;;  %vm743_vm3 = vcmp.gt.s32.totalorder %v1417_v59, %v733_v9  ;;  %v748_v10 = vsel %vm737_vm12, %v1437_v32, 2147483647 }
 0x1a3   :  { %v749_v11 = vsel %vm738_vm13, %v1411_v53, 2147483647  ;;  %v750_v12 = vsel %vm739_vm15, %v1407_v49, 2147483647  ;;  %vm744_vm7 = vcmp.gt.s32.totalorder %v1446_v16, %v733_v9  ;;  %v751_v13 = vsel %vm740_vm0, %v1424_v63, 2147483647 }
 0x1a4   :  { %v752_v54 = vsel %vm741_vm1, %v1432_v5, 2147483647  ;;  %v753_v14 = vsel %vm742_vm2, %v1421_v61, 2147483647  ;;  %v754_v15 = vsel %vm743_vm3, %v1417_v59, 2147483647 }
 0x1a5   :  { %vm1236_vm11 = vcmp.gt.s32.totalorder %v749_v11, 2147483647  ;;  %vm1237_vm8 = vcmp.gt.s32.totalorder %v750_v12, 2147483647  ;;  %vm1238_vm9 = vcmp.gt.s32.totalorder %v751_v13, 2147483647  ;;  %vm762_vm6 = vcmp.lt.s32.totalorder %v748_v10, %v752_v54 }
 0x1a6   :  { %v757_v17 = vsel %vm1236_vm11, 2147483647, %v749_v11  ;;  %v755_v18 = vsel %vm744_vm7, %v1446_v16, 2147483647  ;;  %v759_v20 = vsel %vm1237_vm8, 2147483647, %v750_v12  ;;  %v763_v26 = vsel %vm762_vm6, %v748_v10, %v752_v54 }
 0x1a7   :  { %v761_v22 = vsel %vm1238_vm9, 2147483647, %v751_v13  ;;  %vm764_vm12 = vcmp.lt.s32.totalorder %v757_v17, %v753_v14  ;;  %vm766_vm13 = vcmp.lt.s32.totalorder %v759_v20, %v754_v15 }
 0x1a8   :  { %v765_v24 = vsel %vm764_vm12, %v757_v17, %v753_v14  ;;  %vm768_vm15 = vcmp.lt.s32.totalorder %v761_v22, %v755_v18  ;;  %v767_v27 = vsel %vm766_vm13, %v759_v20, %v754_v15 }
 0x1a9   :  { %v769_v28 = vsel %vm768_vm15, %v761_v22, %v755_v18  ;;  %vm770_vm0 = vcmp.lt.s32.totalorder %v765_v24, %v767_v27 }
 0x1aa   :  { %vm772_vm1 = vcmp.lt.s32.totalorder %v769_v28, %v763_v26  ;;  %v771_v31 = vsel %vm770_vm0, %v765_v24, %v767_v27 }
 0x1ab   :  { %v773_v33 = vsel %vm772_vm1, %v769_v28, %v763_v26 }
 0x1ac   :  { %vm774_vm2 = vcmp.lt.s32.totalorder %v771_v31, %v773_v33 }
 0x1ad   :  { %v775_v34 = vsel %vm774_vm2, %v771_v31, %v773_v33 }
 0x1ae   :  { %v776_v35 = vrot.slane %v775_v34, 4 }
 0x1b0   :  { %vm777_vm3 = vcmp.lt.s32.totalorder %v775_v34, %v776_v35 }
 0x1b1   :  { %v778_v36 = vsel %vm777_vm3, %v775_v34, %v776_v35 }
 0x1b2   :  { %v779_v25 = vrot.slane %v778_v36, 2 }
 0x1b4   :  { %vm780_vm7 = vcmp.lt.s32.totalorder %v778_v36, %v779_v25 }
 0x1b5   :  { %v781_v37 = vsel %vm780_vm7, %v778_v36, %v779_v25 }
 0x1b6   :  { %v782_v38 = vrot.slane %v781_v37, 1 }
 0x1b8   :  { %vm783_vm9 = vcmp.lt.s32.totalorder %v781_v37, %v782_v38 }
 0x1b9   :  { %v784_v40 = vsel %vm783_vm9, %v781_v37, %v782_v38 }
 0x1ba   :  { %vm788_vm11 = vcmp.gt.s32.totalorder %v1437_v32, %v784_v40  ;;  %vm789_vm6 = vcmp.gt.s32.totalorder %v1411_v53, %v784_v40  ;;  %vm790_vm8 = vcmp.gt.s32.totalorder %v1407_v49, %v784_v40  ;;  %vm791_vm12 = vcmp.gt.s32.totalorder %v1424_v63, %v784_v40 }
 0x1bb   :  { %vm792_vm13 = vcmp.gt.s32.totalorder %v1432_v5, %v784_v40  ;;  %vm793_vm15 = vcmp.gt.s32.totalorder %v1421_v61, %v784_v40  ;;  %vm794_vm0 = vcmp.gt.s32.totalorder %v1417_v59, %v784_v40  ;;  %v799_v42 = vsel %vm788_vm11, %v1437_v32, 2147483647 }
 0x1bc   :  { %v800_v43 = vsel %vm789_vm6, %v1411_v53, 2147483647  ;;  %v801_v21 = vsel %vm790_vm8, %v1407_v49, 2147483647  ;;  %v1156_v44 = vsel %vm1142_vm4, %v733_v9, %v784_v40  ;;  %vm795_vm1 = vcmp.gt.s32.totalorder %v1446_v16, %v784_v40 }
 0x1bd   :  { %v802_v41 = vsel %vm791_vm12, %v1424_v63, 2147483647  ;;  %v803_v7 = vsel %vm792_vm13, %v1432_v5, 2147483647  ;;  %v804_v19 = vsel %vm793_vm15, %v1421_v61, 2147483647 }
 0x1be   :  { %v805_v45 = vsel %vm794_vm0, %v1417_v59, 2147483647  ;;  %vm1240_vm2 = vcmp.gt.s32.totalorder %v800_v43, 2147483647  ;;  %vm1241_vm3 = vcmp.gt.s32.totalorder %v801_v21, 2147483647  ;;  %vm813_vm9 = vcmp.lt.s32.totalorder %v799_v42, %v803_v7 }
 0x1bf   :  { %v808_v46 = vsel %vm1240_vm2, 2147483647, %v800_v43  ;;  %vm1242_vm7 = vcmp.gt.s32.totalorder %v802_v41, 2147483647  ;;  %v806_v47 = vsel %vm795_vm1, %v1446_v16, 2147483647  ;;  %v814_v52 = vsel %vm813_vm9, %v799_v42, %v803_v7 }
 0x1c0   :  { %v810_v48 = vsel %vm1241_vm3, 2147483647, %v801_v21  ;;  %v812_v50 = vsel %vm1242_vm7, 2147483647, %v802_v41  ;;  %vm815_vm11 = vcmp.lt.s32.totalorder %v808_v46, %v804_v19 }
 0x1c1   :  { %v816_v51 = vsel %vm815_vm11, %v808_v46, %v804_v19  ;;  %vm817_vm6 = vcmp.lt.s32.totalorder %v810_v48, %v805_v45  ;;  %vm819_vm8 = vcmp.lt.s32.totalorder %v812_v50, %v806_v47 }
 0x1c2   :  { %v818_v55 = vsel %vm817_vm6, %v810_v48, %v805_v45  ;;  %v820_v56 = vsel %vm819_vm8, %v812_v50, %v806_v47 }
 0x1c3   :  { %vm821_vm12 = vcmp.lt.s32.totalorder %v816_v51, %v818_v55  ;;  %vm823_vm13 = vcmp.lt.s32.totalorder %v820_v56, %v814_v52 }
 0x1c4   :  { %v822_v57 = vsel %vm821_vm12, %v816_v51, %v818_v55  ;;  %v824_v58 = vsel %vm823_vm13, %v820_v56, %v814_v52 }
 0x1c5   :  { %vm825_vm15 = vcmp.lt.s32.totalorder %v822_v57, %v824_v58 }
 0x1c6   :  { %v826_v23 = vsel %vm825_vm15, %v822_v57, %v824_v58 }
 0x1c7   :  { %v827_v30 = vrot.slane %v826_v23, 4 }
 0x1c9   :  { %vm828_vm0 = vcmp.lt.s32.totalorder %v826_v23, %v827_v30 }
 0x1ca   :  { %v829_v29 = vsel %vm828_vm0, %v826_v23, %v827_v30 }
 0x1cb   :  { %v830_v39 = vrot.slane %v829_v29, 2 }
 0x1cd   :  { %vm831_vm1 = vcmp.lt.s32.totalorder %v829_v29, %v830_v39 }
 0x1ce   :  { %v832_v60 = vsel %vm831_vm1, %v829_v29, %v830_v39 }
 0x1cf   :  { %v833_v62 = vrot.slane %v832_v60, 1 }
 0x1d1   :  { %vm834_vm2 = vcmp.lt.s32.totalorder %v832_v60, %v833_v62 }
 0x1d2   :  { %v835_v0 = vsel %vm834_vm2, %v832_v60, %v833_v62 }
 0x1d3   :  { %vm839_vm3 = vcmp.gt.s32.totalorder %v1437_v32, %v835_v0  ;;  %vm840_vm7 = vcmp.gt.s32.totalorder %v1411_v53, %v835_v0  ;;  %vm841_vm9 = vcmp.gt.s32.totalorder %v1407_v49, %v835_v0  ;;  %vm842_vm11 = vcmp.gt.s32.totalorder %v1424_v63, %v835_v0 }
 0x1d4   :  { %vm843_vm6 = vcmp.gt.s32.totalorder %v1432_v5, %v835_v0  ;;  %vm844_vm8 = vcmp.gt.s32.totalorder %v1421_v61, %v835_v0  ;;  %vm845_vm12 = vcmp.gt.s32.totalorder %v1417_v59, %v835_v0  ;;  %v850_v1 = vsel %vm839_vm3, %v1437_v32, 2147483647 }
 0x1d5   :  { %v851_v2 = vsel %vm840_vm7, %v1411_v53, 2147483647  ;;  %v852_v3 = vsel %vm841_vm9, %v1407_v49, 2147483647  ;;  %v1157_v4 = vsel %vm1144_vm10, %v1156_v44, %v835_v0  ;;  %vm846_vm13 = vcmp.gt.s32.totalorder %v1446_v16, %v835_v0 }
 0x1d6   :  { %v853_v6 = vsel %vm842_vm11, %v1424_v63, 2147483647  ;;  %v854_v8 = vsel %vm843_vm6, %v1432_v5, 2147483647  ;;  %v855_v9 = vsel %vm844_vm8, %v1421_v61, 2147483647 }
 0x1d7   :  { %v856_v10 = vsel %vm845_vm12, %v1417_v59, 2147483647  ;;  %vm1244_vm15 = vcmp.gt.s32.totalorder %v851_v2, 2147483647  ;;  %vm1245_vm0 = vcmp.gt.s32.totalorder %v852_v3, 2147483647  ;;  %vm864_vm2 = vcmp.lt.s32.totalorder %v850_v1, %v854_v8 }
 0x1d8   :  { %v859_v11 = vsel %vm1244_vm15, 2147483647, %v851_v2  ;;  %vm1246_vm1 = vcmp.gt.s32.totalorder %v853_v6, 2147483647  ;;  %v857_v12 = vsel %vm846_vm13, %v1446_v16, 2147483647  ;;  %v865_v15 = vsel %vm864_vm2, %v850_v1, %v854_v8 }
 0x1d9   :  { %v861_v13 = vsel %vm1245_vm0, 2147483647, %v852_v3  ;;  %v863_v54 = vsel %vm1246_vm1, 2147483647, %v853_v6  ;;  %vm866_vm3 = vcmp.lt.s32.totalorder %v859_v11, %v855_v9 }
 0x1da   :  { %v867_v14 = vsel %vm866_vm3, %v859_v11, %v855_v9  ;;  %vm868_vm7 = vcmp.lt.s32.totalorder %v861_v13, %v856_v10  ;;  %vm870_vm9 = vcmp.lt.s32.totalorder %v863_v54, %v857_v12 }
 0x1db   :  { %v869_v17 = vsel %vm868_vm7, %v861_v13, %v856_v10  ;;  %v871_v18 = vsel %vm870_vm9, %v863_v54, %v857_v12 }
 0x1dc   :  { %vm872_vm11 = vcmp.lt.s32.totalorder %v867_v14, %v869_v17  ;;  %vm874_vm6 = vcmp.lt.s32.totalorder %v871_v18, %v865_v15 }
 0x1dd   :  { %v873_v20 = vsel %vm872_vm11, %v867_v14, %v869_v17  ;;  %v875_v22 = vsel %vm874_vm6, %v871_v18, %v865_v15 }
 0x1de   :  { %vm876_vm8 = vcmp.lt.s32.totalorder %v873_v20, %v875_v22 }
 0x1df   :  { %v877_v24 = vsel %vm876_vm8, %v873_v20, %v875_v22 }
 0x1e0   :  { %v878_v26 = vrot.slane %v877_v24, 4 }
 0x1e2   :  { %vm879_vm12 = vcmp.lt.s32.totalorder %v877_v24, %v878_v26 }
 0x1e3   :  { %v880_v27 = vsel %vm879_vm12, %v877_v24, %v878_v26 }
 0x1e4   :  { %v881_v28 = vrot.slane %v880_v27, 2 }
 0x1e6   :  { %vm882_vm13 = vcmp.lt.s32.totalorder %v880_v27, %v881_v28 }
 0x1e7   :  { %v883_v31 = vsel %vm882_vm13, %v880_v27, %v881_v28 }
 0x1e8   :  { %v884_v33 = vrot.slane %v883_v31, 1 }
 0x1ea   :  { %vm885_vm15 = vcmp.lt.s32.totalorder %v883_v31, %v884_v33 }
 0x1eb   :  { %v886_v34 = vsel %vm885_vm15, %v883_v31, %v884_v33 }
 0x1ec   :  { %vm890_vm0 = vcmp.gt.s32.totalorder %v1437_v32, %v886_v34  ;;  %vm891_vm1 = vcmp.gt.s32.totalorder %v1411_v53, %v886_v34  ;;  %vm892_vm2 = vcmp.gt.s32.totalorder %v1407_v49, %v886_v34  ;;  %vm893_vm3 = vcmp.gt.s32.totalorder %v1424_v63, %v886_v34 }
 0x1ed   :  { %vm894_vm7 = vcmp.gt.s32.totalorder %v1432_v5, %v886_v34  ;;  %vm895_vm9 = vcmp.gt.s32.totalorder %v1421_v61, %v886_v34  ;;  %vm896_vm11 = vcmp.gt.s32.totalorder %v1417_v59, %v886_v34  ;;  %v901_v35 = vsel %vm890_vm0, %v1437_v32, 2147483647 }
 0x1ee   :  { %v902_v36 = vsel %vm891_vm1, %v1411_v53, 2147483647  ;;  %v903_v25 = vsel %vm892_vm2, %v1407_v49, 2147483647  ;;  %v1158_v37 = vsel %vm1146_vm14, %v1157_v4, %v886_v34  ;;  %vm897_vm6 = vcmp.gt.s32.totalorder %v1446_v16, %v886_v34 }
 0x1ef   :  { %v904_v38 = vsel %vm893_vm3, %v1424_v63, 2147483647  ;;  %v905_v40 = vsel %vm894_vm7, %v1432_v5, 2147483647  ;;  %v906_v42 = vsel %vm895_vm9, %v1421_v61, 2147483647 }
 0x1f0   :  { %v907_v43 = vsel %vm896_vm11, %v1417_v59, 2147483647  ;;  %vm1248_vm8 = vcmp.gt.s32.totalorder %v902_v36, 2147483647  ;;  %vm1249_vm12 = vcmp.gt.s32.totalorder %v903_v25, 2147483647  ;;  %vm915_vm15 = vcmp.lt.s32.totalorder %v901_v35, %v905_v40 }
 0x1f1   :  { %v910_v21 = vsel %vm1248_vm8, 2147483647, %v902_v36  ;;  %vm1250_vm13 = vcmp.gt.s32.totalorder %v904_v38, 2147483647  ;;  %v908_v44 = vsel %vm897_vm6, %v1446_v16, 2147483647  ;;  %v916_v45 = vsel %vm915_vm15, %v901_v35, %v905_v40 }
 0x1f2   :  { %v912_v41 = vsel %vm1249_vm12, 2147483647, %v903_v25  ;;  %v914_v7 = vsel %vm1250_vm13, 2147483647, %v904_v38  ;;  %vm917_vm0 = vcmp.lt.s32.totalorder %v910_v21, %v906_v42 }
 0x1f3   :  { %v918_v19 = vsel %vm917_vm0, %v910_v21, %v906_v42  ;;  %vm919_vm1 = vcmp.lt.s32.totalorder %v912_v41, %v907_v43  ;;  %vm921_vm2 = vcmp.lt.s32.totalorder %v914_v7, %v908_v44 }
 0x1f4   :  { %v920_v46 = vsel %vm919_vm1, %v912_v41, %v907_v43  ;;  %v922_v47 = vsel %vm921_vm2, %v914_v7, %v908_v44 }
 0x1f5   :  { %vm923_vm3 = vcmp.lt.s32.totalorder %v918_v19, %v920_v46  ;;  %vm925_vm7 = vcmp.lt.s32.totalorder %v922_v47, %v916_v45 }
 0x1f6   :  { %v924_v48 = vsel %vm923_vm3, %v918_v19, %v920_v46  ;;  %v926_v50 = vsel %vm925_vm7, %v922_v47, %v916_v45 }
 0x1f7   :  { %vm927_vm9 = vcmp.lt.s32.totalorder %v924_v48, %v926_v50 }
 0x1f8   :  { %v928_v51 = vsel %vm927_vm9, %v924_v48, %v926_v50 }
 0x1f9   :  { %v929_v52 = vrot.slane %v928_v51, 4 }
 0x1fb   :  { %vm930_vm11 = vcmp.lt.s32.totalorder %v928_v51, %v929_v52 }
 0x1fc   :  { %v931_v55 = vsel %vm930_vm11, %v928_v51, %v929_v52 }
 0x1fd   :  { %v932_v56 = vrot.slane %v931_v55, 2 }
 0x1ff   :  { %vm933_vm6 = vcmp.lt.s32.totalorder %v931_v55, %v932_v56 }
 0x200   :  { %v934_v57 = vsel %vm933_vm6, %v931_v55, %v932_v56 }
 0x201   :  { %v935_v58 = vrot.slane %v934_v57, 1 }
 0x203   :  { %vm936_vm8 = vcmp.lt.s32.totalorder %v934_v57, %v935_v58 }
 0x204   :  { %v937_v23 = vsel %vm936_vm8, %v934_v57, %v935_v58 }
 0x205   :  { %vm941_vm12 = vcmp.gt.s32.totalorder %v1437_v32, %v937_v23  ;;  %vm942_vm13 = vcmp.gt.s32.totalorder %v1411_v53, %v937_v23  ;;  %vm943_vm15 = vcmp.gt.s32.totalorder %v1407_v49, %v937_v23  ;;  %vm944_vm0 = vcmp.gt.s32.totalorder %v1424_v63, %v937_v23 }
 0x206   :  { %vm945_vm1 = vcmp.gt.s32.totalorder %v1432_v5, %v937_v23  ;;  %vm946_vm2 = vcmp.gt.s32.totalorder %v1421_v61, %v937_v23  ;;  %vm947_vm3 = vcmp.gt.s32.totalorder %v1417_v59, %v937_v23  ;;  %v952_v30 = vsel %vm941_vm12, %v1437_v32, 2147483647 }
 0x207   :  { %v953_v29 = vsel %vm942_vm13, %v1411_v53, 2147483647  ;;  %v954_v39 = vsel %vm943_vm15, %v1407_v49, 2147483647  ;;  %v1711_v60 = vsel %vm1148_vm5, %v1158_v37, %v937_v23  ;;  %vm948_vm7 = vcmp.gt.s32.totalorder %v1446_v16, %v937_v23 }
 0x208   :  { %v955_v62 = vsel %vm944_vm0, %v1424_v63, 2147483647  ;;  %v956_v0 = vsel %vm945_vm1, %v1432_v5, 2147483647  ;;  %v957_v1 = vsel %vm946_vm2, %v1421_v61, 2147483647 }
 0x209   :  { %v958_v2 = vsel %vm947_vm3, %v1417_v59, 2147483647  ;;  %vm1252_vm9 = vcmp.gt.s32.totalorder %v953_v29, 2147483647  ;;  %vm1253_vm11 = vcmp.gt.s32.totalorder %v954_v39, 2147483647  ;;  %vm966_vm8 = vcmp.lt.s32.totalorder %v952_v30, %v956_v0 }
 0x20a   :  { %v961_v3 = vsel %vm1252_vm9, 2147483647, %v953_v29  ;;  %vm1254_vm6 = vcmp.gt.s32.totalorder %v955_v62, 2147483647  ;;  %v959_v4 = vsel %vm948_vm7, %v1446_v16, 2147483647  ;;  %v967_v10 = vsel %vm966_vm8, %v952_v30, %v956_v0 }
 0x20b   :  { %v963_v6 = vsel %vm1253_vm11, 2147483647, %v954_v39  ;;  %v965_v8 = vsel %vm1254_vm6, 2147483647, %v955_v62  ;;  %vm968_vm12 = vcmp.lt.s32.totalorder %v961_v3, %v957_v1 }
 0x20c   :  { %v969_v9 = vsel %vm968_vm12, %v961_v3, %v957_v1  ;;  %vm970_vm13 = vcmp.lt.s32.totalorder %v963_v6, %v958_v2  ;;  %vm972_vm15 = vcmp.lt.s32.totalorder %v965_v8, %v959_v4 }
 0x20d   :  { %v971_v11 = vsel %vm970_vm13, %v963_v6, %v958_v2  ;;  %v973_v12 = vsel %vm972_vm15, %v965_v8, %v959_v4 }
 0x20e   :  { %vm974_vm0 = vcmp.lt.s32.totalorder %v969_v9, %v971_v11  ;;  %vm976_vm1 = vcmp.lt.s32.totalorder %v973_v12, %v967_v10 }
 0x20f   :  { %v975_v13 = vsel %vm974_vm0, %v969_v9, %v971_v11  ;;  %v977_v54 = vsel %vm976_vm1, %v973_v12, %v967_v10 }
 0x210   :  { %vm978_vm2 = vcmp.lt.s32.totalorder %v975_v13, %v977_v54 }
 0x211   :  { %v979_v14 = vsel %vm978_vm2, %v975_v13, %v977_v54 }
 0x212   :  { %v980_v15 = vrot.slane %v979_v14, 4 }
 0x214   :  { %vm981_vm3 = vcmp.lt.s32.totalorder %v979_v14, %v980_v15 }
 0x215   :  { %v982_v17 = vsel %vm981_vm3, %v979_v14, %v980_v15 }
 0x216   :  { %v983_v18 = vrot.slane %v982_v17, 2 }
 0x218   :  { %vm984_vm7 = vcmp.lt.s32.totalorder %v982_v17, %v983_v18 }
 0x219   :  { %v985_v20 = vsel %vm984_vm7, %v982_v17, %v983_v18 }
 0x21a   :  { %v986_v22 = vrot.slane %v985_v20, 1 }
 0x21c   :  { %vm987_vm9 = vcmp.lt.s32.totalorder %v985_v20, %v986_v22 }
 0x21d   :  { %v1719_v24 = vsel %vm987_vm9, %v985_v20, %v986_v22 }
 0x21e   :  { %vm992_vm11 = vcmp.gt.s32.totalorder %v1437_v32, %v1719_v24  ;;  %vm993_vm6 = vcmp.gt.s32.totalorder %v1411_v53, %v1719_v24  ;;  %vm994_vm8 = vcmp.gt.s32.totalorder %v1407_v49, %v1719_v24  ;;  %vm995_vm12 = vcmp.gt.s32.totalorder %v1424_v63, %v1719_v24 }
 0x21f   :  { %vm996_vm13 = vcmp.gt.s32.totalorder %v1432_v5, %v1719_v24  ;;  %vm997_vm15 = vcmp.gt.s32.totalorder %v1421_v61, %v1719_v24  ;;  %vm998_vm0 = vcmp.gt.s32.totalorder %v1417_v59, %v1719_v24  ;;  %v1003_v26 = vsel %vm992_vm11, %v1437_v32, 2147483647 }
 0x220   :  { %v1004_v27 = vsel %vm993_vm6, %v1411_v53, 2147483647  ;;  %v1005_v28 = vsel %vm994_vm8, %v1407_v49, 2147483647  ;;  %vm999_vm1 = vcmp.gt.s32.totalorder %v1446_v16, %v1719_v24  ;;  %v1006_v31 = vsel %vm995_vm12, %v1424_v63, 2147483647 }
 0x221   :  { %v1007_v33 = vsel %vm996_vm13, %v1432_v5, 2147483647  ;;  %v1008_v34 = vsel %vm997_vm15, %v1421_v61, 2147483647  ;;  %v1009_v35 = vsel %vm998_vm0, %v1417_v59, 2147483647 }
 0x222   :  { %vm1256_vm2 = vcmp.gt.s32.totalorder %v1004_v27, 2147483647  ;;  %vm1257_vm3 = vcmp.gt.s32.totalorder %v1005_v28, 2147483647  ;;  %vm1258_vm7 = vcmp.gt.s32.totalorder %v1006_v31, 2147483647  ;;  %vm1017_vm9 = vcmp.lt.s32.totalorder %v1003_v26, %v1007_v33 }
 0x223   :  { %v1012_v36 = vsel %vm1256_vm2, 2147483647, %v1004_v27  ;;  %v1010_v25 = vsel %vm999_vm1, %v1446_v16, 2147483647  ;;  %v1014_v37 = vsel %vm1257_vm3, 2147483647, %v1005_v28  ;;  %v1018_v42 = vsel %vm1017_vm9, %v1003_v26, %v1007_v33 }
 0x224   :  { %v1016_v38 = vsel %vm1258_vm7, 2147483647, %v1006_v31  ;;  %vm1019_vm11 = vcmp.lt.s32.totalorder %v1012_v36, %v1008_v34  ;;  %vm1021_vm6 = vcmp.lt.s32.totalorder %v1014_v37, %v1009_v35 }
 0x225   :  { %v1020_v40 = vsel %vm1019_vm11, %v1012_v36, %v1008_v34  ;;  %vm1023_vm8 = vcmp.lt.s32.totalorder %v1016_v38, %v1010_v25  ;;  %v1022_v43 = vsel %vm1021_vm6, %v1014_v37, %v1009_v35 }
 0x226   :  { %v1024_v21 = vsel %vm1023_vm8, %v1016_v38, %v1010_v25  ;;  %vm1025_vm12 = vcmp.lt.s32.totalorder %v1020_v40, %v1022_v43 }
 0x227   :  { %vm1027_vm13 = vcmp.lt.s32.totalorder %v1024_v21, %v1018_v42  ;;  %v1026_v44 = vsel %vm1025_vm12, %v1020_v40, %v1022_v43 }
 0x228   :  { %v1028_v41 = vsel %vm1027_vm13, %v1024_v21, %v1018_v42 }
 0x229   :  { %vm1029_vm15 = vcmp.lt.s32.totalorder %v1026_v44, %v1028_v41 }
 0x22a   :  { %v1030_v7 = vsel %vm1029_vm15, %v1026_v44, %v1028_v41 }
 0x22b   :  { %v1031_v19 = vrot.slane %v1030_v7, 4 }
 0x22d   :  { %vm1032_vm0 = vcmp.lt.s32.totalorder %v1030_v7, %v1031_v19 }
 0x22e   :  { %v1033_v45 = vsel %vm1032_vm0, %v1030_v7, %v1031_v19 }
 0x22f   :  { %v1034_v46 = vrot.slane %v1033_v45, 2 }
 0x231   :  { %vm1035_vm1 = vcmp.lt.s32.totalorder %v1033_v45, %v1034_v46 }
 0x232   :  { %v1036_v47 = vsel %vm1035_vm1, %v1033_v45, %v1034_v46 }
 0x233   :  { %v1037_v48 = vrot.slane %v1036_v47, 1 }
 0x235   :  { %vm1038_vm2 = vcmp.lt.s32.totalorder %v1036_v47, %v1037_v48 }
 0x236   :  { %v1039_v50 = vsel %vm1038_vm2, %v1036_v47, %v1037_v48 }
 0x237   :  { %vm1043_vm3 = vcmp.gt.s32.totalorder %v1437_v32, %v1039_v50  ;;  %vm1044_vm7 = vcmp.gt.s32.totalorder %v1411_v53, %v1039_v50  ;;  %vm1045_vm9 = vcmp.gt.s32.totalorder %v1407_v49, %v1039_v50  ;;  %vm1046_vm11 = vcmp.gt.s32.totalorder %v1424_v63, %v1039_v50 }
 0x238   :  { %vm1047_vm6 = vcmp.gt.s32.totalorder %v1432_v5, %v1039_v50  ;;  %vm1048_vm8 = vcmp.gt.s32.totalorder %v1421_v61, %v1039_v50  ;;  %vm1049_vm12 = vcmp.gt.s32.totalorder %v1417_v59, %v1039_v50  ;;  %v1054_v51 = vsel %vm1043_vm3, %v1437_v32, 2147483647 }
 0x239   :  { %v1055_v52 = vsel %vm1044_vm7, %v1411_v53, 2147483647  ;;  %v1056_v55 = vsel %vm1045_vm9, %v1407_v49, 2147483647  ;;  %vm1050_vm13 = vcmp.gt.s32.totalorder %v1446_v16, %v1039_v50  ;;  %v1057_v56 = vsel %vm1046_vm11, %v1424_v63, 2147483647 }
 0x23a   :  { %v1058_v57 = vsel %vm1047_vm6, %v1432_v5, 2147483647  ;;  %v1059_v58 = vsel %vm1048_vm8, %v1421_v61, 2147483647  ;;  %v1060_v23 = vsel %vm1049_vm12, %v1417_v59, 2147483647 }
 0x23b   :  { %vm1260_vm15 = vcmp.gt.s32.totalorder %v1055_v52, 2147483647  ;;  %vm1261_vm0 = vcmp.gt.s32.totalorder %v1056_v55, 2147483647  ;;  %vm1262_vm1 = vcmp.gt.s32.totalorder %v1057_v56, 2147483647  ;;  %vm1068_vm2 = vcmp.lt.s32.totalorder %v1054_v51, %v1058_v57 }
 0x23c   :  { %v1063_v30 = vsel %vm1260_vm15, 2147483647, %v1055_v52  ;;  %v1061_v29 = vsel %vm1050_vm13, %v1446_v16, 2147483647  ;;  %v1065_v39 = vsel %vm1261_vm0, 2147483647, %v1056_v55  ;;  %v1069_v1 = vsel %vm1068_vm2, %v1054_v51, %v1058_v57 }
 0x23d   :  { %v1067_v62 = vsel %vm1262_vm1, 2147483647, %v1057_v56  ;;  %vm1070_vm3 = vcmp.lt.s32.totalorder %v1063_v30, %v1059_v58  ;;  %vm1072_vm7 = vcmp.lt.s32.totalorder %v1065_v39, %v1060_v23  ;;  %vm1798_vm0 = vcmask 1044480  }
 0x23e   :  { %v1071_v0 = vsel %vm1070_vm3, %v1063_v30, %v1059_v58  ;;  %vm1074_vm9 = vcmp.lt.s32.totalorder %v1067_v62, %v1061_v29  ;;  %v1073_v2 = vsel %vm1072_vm7, %v1065_v39, %v1060_v23  ;;  %v1160_v14 = vsel %vm1798_vm0, %v1711_v60, %v1719_v24 }
 0x23f   :  { %v1075_v3 = vsel %vm1074_vm9, %v1067_v62, %v1061_v29  ;;  %vm1076_vm11 = vcmp.lt.s32.totalorder %v1071_v0, %v1073_v2 }
 0x240   :  { %vm1078_vm6 = vcmp.lt.s32.totalorder %v1075_v3, %v1069_v1  ;;  %v1077_v4 = vsel %vm1076_vm11, %v1071_v0, %v1073_v2 }
 0x241   :  { %v1079_v6 = vsel %vm1078_vm6, %v1075_v3, %v1069_v1 }
 0x242   :  { %vm1080_vm8 = vcmp.lt.s32.totalorder %v1077_v4, %v1079_v6 }
 0x243   :  { %v1081_v8 = vsel %vm1080_vm8, %v1077_v4, %v1079_v6 }
 0x244   :  { %v1082_v9 = vrot.slane %v1081_v8, 4 }
 0x246   :  { %vm1083_vm12 = vcmp.lt.s32.totalorder %v1081_v8, %v1082_v9 }
 0x247   :  { %v1084_v10 = vsel %vm1083_vm12, %v1081_v8, %v1082_v9  ;;  %vm1799_vm12 = vcmask 1045504  }
 0x248   :  { %v1085_v11 = vrot.slane %v1084_v10, 2  ;;  %v1161_v18 = vsel %vm1799_vm12, %v1160_v14, %v1039_v50 }
 0x24a   :  { %vm1086_vm13 = vcmp.lt.s32.totalorder %v1084_v10, %v1085_v11 }
 0x24b   :  { %v1087_v12 = vsel %vm1086_vm13, %v1084_v10, %v1085_v11  ;;  %vm1800_vm13 = vcmask 1046528  }
 0x24c   :  { %v1088_v13 = vrot.slane %v1087_v12, 1 }
 0x24e   :  { %vm1089_vm15 = vcmp.lt.s32.totalorder %v1087_v12, %v1088_v13 }
 0x24f   :  { %v1090_v54 = vsel %vm1089_vm15, %v1087_v12, %v1088_v13 }
 0x250   :  { %vm1094_vm1 = vcmp.gt.s32.totalorder %v1437_v32, %v1090_v54  ;;  %vm1095_vm2 = vcmp.gt.s32.totalorder %v1411_v53, %v1090_v54  ;;  %vm1096_vm3 = vcmp.gt.s32.totalorder %v1407_v49, %v1090_v54  ;;  %vm1097_vm7 = vcmp.gt.s32.totalorder %v1424_v63, %v1090_v54 }
 0x251   :  { %vm1098_vm9 = vcmp.gt.s32.totalorder %v1432_v5, %v1090_v54  ;;  %vm1099_vm11 = vcmp.gt.s32.totalorder %v1421_v61, %v1090_v54  ;;  %vm1100_vm6 = vcmp.gt.s32.totalorder %v1417_v59, %v1090_v54  ;;  %vm1101_vm8 = vcmp.gt.s32.totalorder %v1446_v16, %v1090_v54 }
 0x252   :  { %v1105_v15 = vsel %vm1094_vm1, %v1437_v32, 2147483647  ;;  %v1106_v60 = vsel %vm1095_vm2, %v1411_v53, 2147483647  ;;  %v1107_v17 = vsel %vm1096_vm3, %v1407_v49, 2147483647  ;;  %v1162_v26 = vsel %vm1800_vm13, %v1161_v18, %v1090_v54 }
 0x253   :  { %v1108_v20 = vsel %vm1097_vm7, %v1424_v63, 2147483647  ;;  %v1109_v22 = vsel %vm1098_vm9, %v1432_v5, 2147483647  ;;  %v1110_v24 = vsel %vm1099_vm11, %v1421_v61, 2147483647 }
 0x254   :  { %v1111_v27 = vsel %vm1100_vm6, %v1417_v59, 2147483647  ;;  %v1112_v28 = vsel %vm1101_vm8, %v1446_v16, 2147483647  ;;  %vm1264_vm15 = vcmp.gt.s32.totalorder %v1106_v60, 2147483647  ;;  %vm1119_vm2 = vcmp.lt.s32.totalorder %v1105_v15, %v1109_v22 }
 0x255   :  { %v1114_v32 = vsel %vm1264_vm15, 2147483647, %v1106_v60  ;;  %vm1265_vm0 = vcmp.gt.s32.totalorder %v1107_v17, 2147483647  ;;  %vm1266_vm1 = vcmp.gt.s32.totalorder %v1108_v20, 2147483647  ;;  %v1120_v5 = vsel %vm1119_vm2, %v1105_v15, %v1109_v22 }
 0x256   :  { %v1116_v49 = vsel %vm1265_vm0, 2147483647, %v1107_v17  ;;  %v1118_v53 = vsel %vm1266_vm1, 2147483647, %v1108_v20  ;;  %vm1121_vm3 = vcmp.lt.s32.totalorder %v1114_v32, %v1110_v24  ;;  %v1177_v31 = vand.u32 63, %v1162_v26 }
 0x257   :  { %v1122_v63 = vsel %vm1121_vm3, %v1114_v32, %v1110_v24  ;;  %vm1123_vm7 = vcmp.lt.s32.totalorder %v1116_v49, %v1111_v27  ;;  %vm1125_vm9 = vcmp.lt.s32.totalorder %v1118_v53, %v1112_v28  ;;  %vm1801_vm0 = vcmask 1044480  }
 0x258   :  { %v1124_v61 = vsel %vm1123_vm7, %v1116_v49, %v1111_v27  ;;  %v1126_v33 = vsel %vm1125_vm9, %v1118_v53, %v1112_v28  ;;  %1180 = vst [vmem:[#allocation3 + $0x8] sm:$0xff] %v1177_v31  ;;  %vm1802_vm1 = vcmask 1045504   ;;  %vm1803_vm2 = vcmask 1046528  }
 0x259   :  { %vm1127_vm11 = vcmp.lt.s32.totalorder %v1122_v63, %v1124_v61  ;;  %vm1129_vm6 = vcmp.lt.s32.totalorder %v1126_v33, %v1120_v5 }
 0x25a   :  { %v1128_v59 = vsel %vm1127_vm11, %v1122_v63, %v1124_v61  ;;  %v1130_v16 = vsel %vm1129_vm6, %v1126_v33, %v1120_v5 }
 0x25b   :  { %vm1131_vm8 = vcmp.lt.s32.totalorder %v1128_v59, %v1130_v16 }
 0x25c   :  { %v1132_v34 = vsel %vm1131_vm8, %v1128_v59, %v1130_v16 }
 0x25d   :  { %v1133_v35 = vrot.slane %v1132_v34, 4 }
 0x25f   :  { %vm1134_vm12 = vcmp.lt.s32.totalorder %v1132_v34, %v1133_v35 }
 0x260   :  { %v1135_v36 = vsel %vm1134_vm12, %v1132_v34, %v1133_v35 }
 0x261   :  { %v1136_v25 = vrot.slane %v1135_v36, 2 }
 0x263   :  { %vm1137_vm13 = vcmp.lt.s32.totalorder %v1135_v36, %v1136_v25 }
 0x264   :  { %v1138_v37 = vsel %vm1137_vm13, %v1135_v36, %v1136_v25 }
 0x265   :  { %v1139_v38 = vrot.slane %v1138_v37, 1 }
 0x267   :  { %vm1140_vm15 = vcmp.lt.s32.totalorder %v1138_v37, %v1139_v38 }
 0x268   :  { %v1141_v40 = vsel %vm1140_vm15, %v1138_v37, %v1139_v38 }
 0x269   :  { %v1163_v42 = vsel %vm1142_vm4, %v1141_v40, 2147483647 }
 0x26a   :  { %v1164_v43 = vsel %vm1144_vm10, %v1163_v42, 2147483647 }
 0x26b   :  { %v1165_v21 = vsel %vm1146_vm14, %v1164_v43, 2147483647 }
 0x26c   :  { %v1166_v44 = vsel %vm1148_vm5, %v1165_v21, 2147483647 }
 0x26d   :  { %v1167_v41 = vsel %vm1801_vm0, %v1166_v44, 2147483647 }
 0x26e   :  { %v1168_v7 = vsel %vm1802_vm1, %v1167_v41, 2147483647 }
 0x26f   :  { %v1169_v19 = vsel %vm1803_vm2, %v1168_v7, 2147483647 }
 0x270   :  { %v1178_v45 = vand.u32 63, %v1169_v19 }
 0x272   :  { %1181 = vst [vmem:[#allocation3 + $0x10] sm:$0xff] %v1178_v45 }
 0x273   :  { %1194 = dma.vmem_to_hbm [thread:$0]  %s1187_s26, 384, %s1189_s29, [#allocation4], %s1315_s30, %s1315_s30, %s1316_s3  }
 0x274   :  { %1309 = dma.done.wait [#allocation4], 384  }
 0x275   :  { %1310 = vsyncadd [#allocation4], 4294966912 }
 0x276   :  { %1199 = vsyncpa [#allocation4], 1 }

</bundles_post_ra>
